<compile_context>
chip_gen: v7x
topology: tpu7x:2x2x1
jax: 0.10.0
libtpu: 0.0.40
codegen_flags: <defaults>
</compile_context>

<pallas_src>
import functools

import jax
import jax.numpy as jnp
from jax.experimental import pallas as pl
from jax.experimental.pallas import tpu as pltpu


def _round_up(x, m):
    return (x + m - 1) // m * m


def _pick_tile_rows(H, Wp, target_rows=256):
    """Largest divisor of H whose tile (rows * padded width) stays <= target."""
    best = 1
    for th in range(1, H + 1):
        if H % th == 0 and th * Wp <= max(Wp, target_rows):
            best = th
    return best


# ----------------------------- Pallas kernel --------------------------------

def _rpn_fused_kernel(x_ref, w1_ref, b1_ref, wh_ref, bh_ref, out_ref,
                      *, tile_rows, wp):
    """One (batch, row-tile) grid step.

    x_ref:   (1, 1, R, CinP)    bf16 halo block: padded rows [t*TH, t*TH+TH+1]
                                of the zero-padded NHWC map, flattened as
                                (padded_row * Wp + padded_col, channel).
    w1_ref:  (9, CinP, CmidP)   bf16 3x3 conv weight, tap-major (dy*3+dx).
    b1_ref:  (1, CmidP)         f32
    wh_ref:  (CmidP, NoutP)     bf16 fused [cls_score | loc_pred] 1x1 weights
    bh_ref:  (1, NoutP)         f32
    out_ref: (1, TH*Wp, NoutP)  f32 fused head output (junk columns at the
                                padded-x positions are stripped by the wrapper)
    """
    m = tile_rows * wp
    xb = x_ref[0, 0]                                       # (R, CinP) bf16
    acc = jnp.zeros((m, w1_ref.shape[-1]), jnp.float32)
    # 3x3 conv as 9 accumulating matmuls: a (dy, dx) tap of the flattened
    # padded map is a static row-offset slice (off = dy*Wp + dx).
    for dy in range(3):
        for dx in range(3):
            off = dy * wp + dx
            acc = acc + jnp.dot(xb[off:off + m, :], w1_ref[dy * 3 + dx],
                                preferred_element_type=jnp.float32)
    conv = jnp.maximum(acc + b1_ref[...], 0.0)             # bias + ReLU in f32
    head = jnp.dot(conv.astype(jnp.bfloat16), wh_ref[...],
                   preferred_element_type=jnp.float32) + bh_ref[...]
    out_ref[0] = head.astype(out_ref.dtype)


def rpn_heads_pallas(feat_nchw, w1, b1, wc, bc, wl, bl, tile_rows=None):
    """conv1(3x3,pad=1) + ReLU + fused cls_score/loc_pred (1x1) on TPU.

    w1: (3, 3, Cin, Cmid); b1: (Cmid,); wc: (Cmid, 2A); bc: (2A,);
    wl: (Cmid, 4A); bl: (4A,).
    Returns (score, loc): (B, H*W, 2A) and (B, H*W, 4A), float32.
    """
    B, Cin, H, W = feat_nchw.shape
    Cmid = w1.shape[-1]
    n_cls = wc.shape[1]
    n_loc = wl.shape[1]
    n_head = n_cls + n_loc

    CinP = _round_up(Cin, 8)         # sublane-align the contraction dim
    CmidP = _round_up(Cmid, 128)     # lane-dense intermediate / head K dim
    NoutP = _round_up(n_head, 128)   # lane-dense fused head output

    Wp = W + 2
    TH = tile_rows if tile_rows is not None else _pick_tile_rows(H, Wp)
    assert H % TH == 0, f"tile_rows={TH} must divide H={H}"
    nT = H // TH
    M = TH * Wp                       # matmul rows per grid step
    # Halo block: TH+2 padded rows plus slack (taps on the right-pad columns of
    # the last tile row read harmlessly a couple of elements past the halo).
    R = _round_up((TH + 2) * Wp + 2, 8)

    # --- activations: NCHW -> NHWC, zero-pad H/W/C, bf16, flatten, halo-block.
    x = jnp.transpose(feat_nchw, (0, 2, 3, 1)).astype(jnp.bfloat16)
    x = jnp.pad(x, ((0, 0), (1, 1), (1, 1), (0, CinP - Cin)))  # (B,H+2,Wp,CinP)
    xflat = x.reshape(B, (H + 2) * Wp, CinP)
    xflat = jnp.pad(xflat, ((0, 0), (0, R - (TH + 2) * Wp), (0, 0)))
    xblk = jnp.stack(
        [xflat[:, t * TH * Wp: t * TH * Wp + R, :] for t in range(nT)],
        axis=1)                                              # (B, nT, R, CinP)

    # --- weights: pad; fuse the two 1x1 heads into one lane-dense matmul.
    w1k = jnp.pad(w1.reshape(9, Cin, Cmid),
                  ((0, 0), (0, CinP - Cin), (0, CmidP - Cmid))
                  ).astype(jnp.bfloat16)
    b1k = jnp.pad(b1.reshape(1, Cmid),
                  ((0, 0), (0, CmidP - Cmid))).astype(jnp.float32)
    whk = jnp.pad(jnp.concatenate([wc, wl], axis=1),
                  ((0, CmidP - Cmid), (0, NoutP - n_head))).astype(jnp.bfloat16)
    bhk = jnp.pad(jnp.concatenate([bc, bl]).reshape(1, n_head),
                  ((0, 0), (0, NoutP - n_head))).astype(jnp.float32)

    flops = B * nT * (2 * M * CinP * CmidP * 9 + 2 * M * CmidP * NoutP)
    bytes_accessed = (B * nT * R * CinP * 2 + 9 * CinP * CmidP * 2
                      + CmidP * NoutP * 2 + (CmidP + NoutP) * 4
                      + B * H * Wp * NoutP * 4)

    kernel = functools.partial(_rpn_fused_kernel, tile_rows=TH, wp=Wp)

    out = pl.pallas_call(
        kernel,
        out_shape=jax.ShapeDtypeStruct((B, H * Wp, NoutP), jnp.float32),
        grid=(B, nT),
        in_specs=[
            # TODO(synk): on v5e consider pipeline_mode=pl.Buffered(3) here.
            pl.BlockSpec((1, 1, R, CinP), lambda b, t: (b, t, 0, 0)),
            pl.BlockSpec((9, CinP, CmidP), lambda b, t: (0, 0, 0)),
            pl.BlockSpec((1, CmidP), lambda b, t: (0, 0)),
            pl.BlockSpec((CmidP, NoutP), lambda b, t: (0, 0)),
            pl.BlockSpec((1, NoutP), lambda b, t: (0, 0)),
        ],
        out_specs=pl.BlockSpec((1, M, NoutP), lambda b, t: (b, t, 0)),
        compiler_params=pltpu.CompilerParams(
            dimension_semantics=("parallel", "parallel"),
            vmem_limit_bytes=48 * 1024 * 1024),
        cost_estimate=pl.CostEstimate(flops=flops, transcendentals=0,
                                      bytes_accessed=bytes_accessed),
    )(xblk, w1k, b1k, whk, bhk)

    # Strip padded-x junk columns and padded output channels.
    out = out.reshape(B, H, Wp, NoutP)[:, :, :W, :n_head]
    score = out[..., :n_cls].reshape(B, H * W, n_cls)
    loc = out[..., n_cls:].reshape(B, H * W, n_loc)
    return score, loc


# ----------------------------- plain-JAX glue --------------------------------

def _reference_heads(feat_nchw, w1, b1, wc, bc, wl, bl):
    """Plain-JAX f32 reference of conv1 + ReLU + heads (numerics check)."""
    B, Cin, H, W = feat_nchw.shape
    Cmid = w1.shape[-1]
    x = jnp.transpose(feat_nchw, (0, 2, 3, 1))
    xp = jnp.pad(x, ((0, 0), (1, 1), (1, 1), (0, 0)))
    conv = jnp.zeros((B, H, W, Cmid), jnp.float32)
    for dy in range(3):
        for dx in range(3):
            conv = conv + jnp.einsum('bhwc,cm->bhwm',
                                     xp[:, dy:dy + H, dx:dx + W, :], w1[dy, dx])
    conv = jnp.maximum(conv + b1, 0.0)
    score = jnp.einsum('bhwm,mo->bhwo', conv, wc) + bc
    loc = jnp.einsum('bhwm,mo->bhwo', conv, wl) + bl
    return score.reshape(B, H * W, -1), loc.reshape(B, H * W, -1)


def generate_anchors(H, W, stride, scales, ratios):
    """Standard Faster-RCNN anchors, (H*W*A, 4) in (y1, x1, y2, x2)."""
    scales = jnp.asarray(scales, jnp.float32)
    ratios = jnp.asarray(ratios, jnp.float32)
    py = px = stride / 2.0
    hs = (stride * scales[None, :] * jnp.sqrt(ratios[:, None])).reshape(-1)
    ws = (stride * scales[None, :] * jnp.sqrt(1.0 / ratios[:, None])).reshape(-1)
    base = jnp.stack([py - hs / 2, px - ws / 2, py + hs / 2, px + ws / 2], 1)
    sy = jnp.arange(H, dtype=jnp.float32) * stride
    sx = jnp.arange(W, dtype=jnp.float32) * stride
    sy, sx = jnp.meshgrid(sy, sx, indexing="ij")
    shifts = jnp.stack([sy.ravel(), sx.ravel(), sy.ravel(), sx.ravel()], 1)
    anchors = shifts[:, None, :] + base[None, :, :]
    return anchors.reshape(-1, 4)


def _decode_and_clip(loc, anchors, img_size):
    """Decode (dy,dx,dh,dw) deltas against anchors, clip to image bounds."""
    h = anchors[:, 2] - anchors[:, 0]
    w = anchors[:, 3] - anchors[:, 1]
    cy = anchors[:, 0] + 0.5 * h
    cx = anchors[:, 1] + 0.5 * w
    dy, dx, dh, dw = loc[:, 0], loc[:, 1], loc[:, 2], loc[:, 3]
    cy = dy * h + cy
    cx = dx * w + cx
    nh = jnp.exp(dh) * h
    nw = jnp.exp(dw) * w
    roi = jnp.stack([cy - 0.5 * nh, cx - 0.5 * nw,
                     cy + 0.5 * nh, cx + 0.5 * nw], axis=1)
    roi = roi.at[:, 0::2].set(jnp.clip(roi[:, 0::2], 0.0, float(img_size[0])))
    roi = roi.at[:, 1::2].set(jnp.clip(roi[:, 1::2], 0.0, float(img_size[1])))
    return roi


def rpn_forward(feat, img_size, params, stride=16,
                scales=(8, 16, 32), ratios=(0.5, 1, 2), scale=1):
    B, Cin, H, W = feat.shape
    A = len(scales) * len(ratios)
    anchors = generate_anchors(H, W, stride, scales, ratios)     # (H*W*A, 4)

    score, loc = rpn_heads_pallas(feat, *params)     # (B,HW,2A), (B,HW,4A)

    # Matches torch permute(0,2,3,1).view(B,-1,4/2): output channels are
    # anchor-major with (bg,fg) / (dy,dx,dh,dw) innermost.
    rpn_loc = loc.reshape(B, H * W * A, 4)
    rpn_scores = score.reshape(B, H * W * A, 2)

    rpn_softmax_scores = jax.nn.softmax(rpn_scores, axis=2)
    rpn_fg_scores = rpn_softmax_scores[..., 1]   # foreground-class channel
    del rpn_fg_scores                            # unused downstream (as in torch)

    rois = []
    roi_indices = []
    for i in range(B):
        # TODO(synk): ProposalCreator (NMS / pre- & post-NMS top-k) not
        # provided; emit all decoded, clipped boxes instead.
        roi = _decode_and_clip(rpn_loc[i], anchors, img_size)
        rois.append(roi)
        roi_indices.append(jnp.full((roi.shape[0],), i, jnp.int32))
    rois = jnp.concatenate(rois, axis=0)
    roi_indices = jnp.concatenate(roi_indices, axis=0)

    return rpn_loc, rpn_scores, rois, roi_indices, anchors


# --------------------------------- main --------------------------------------

if __name__ == "__main__":
    key = jax.random.PRNGKey(0)
    B, Cin, H, W = 2, 4, 16, 16
    Cmid = 8
    stride = 16
    A = 9                                   # len(scales) * len(ratios)
    img_size = (H * stride, W * stride)

    k_feat, k_w1, k_wc, k_wl = jax.random.split(key, 4)
    feat = jax.random.normal(k_feat, (B, Cin, H, W), jnp.float32)

    # _normal_init: weights ~ N(0, 0.01), biases = 0.  Layout vs. torch module:
    #   w1[dy, dx, cin, m] == conv1.weight[m, cin, dy, dx]
    #   wc[m, o]           == cls_score.weight[o, m, 0, 0]  (anchor-major, (bg,fg) inner)
    #   wl[m, o]           == loc_pred.weight[o, m, 0, 0]   (anchor-major, (dy,dx,dh,dw) inner)
    w1 = 0.01 * jax.random.normal(k_w1, (3, 3, Cin, Cmid), jnp.float32)
    b1 = jnp.zeros((Cmid,), jnp.float32)
    wc = 0.01 * jax.random.normal(k_wc, (Cmid, 2 * A), jnp.float32)
    bc = jnp.zeros((2 * A,), jnp.float32)
    wl = 0.01 * jax.random.normal(k_wl, (Cmid, 4 * A), jnp.float32)
    bl = jnp.zeros((4 * A,), jnp.float32)
    params = (w1, b1, wc, bc, wl, bl)

    out = rpn_forward(feat, img_size, params=params, stride=stride)
    jax.block_until_ready(out)

    rpn_loc, rpn_scores, rois, roi_indices, anchors = out
    assert rpn_loc.shape == (B, H * W * A, 4)
    assert rpn_scores.shape == (B, H * W * A, 2)
    assert anchors.shape == (H * W * A, 4)
    assert rois.shape == (B * H * W * A, 4)
    assert roi_indices.shape == (B * H * W * A,)

    # Numerics check against a plain-JAX f32 reference (bf16-stream tolerance).
    score_p, loc_p = rpn_heads_pallas(feat, *params)
    score_r, loc_r = _reference_heads(feat, *params)
    assert float(jnp.max(jnp.abs(score_p - score_r))) < 2e-3
    assert float(jnp.max(jnp.abs(loc_p - loc_r))) < 2e-3

    print("KERNEL_OK")
</pallas_src>

<mosaic_0001>
module attributes {stable_mosaic.version = 11 : i64} {
  func.func @_rpn_fused_kernel(%arg0: i32, %arg1: i32, %arg2: memref<1x1x184x8xbf16, #tpu.memory_space<vmem>>, %arg3: memref<9x8x128xbf16, #tpu.memory_space<vmem>>, %arg4: memref<1x128xf32, #tpu.memory_space<vmem>>, %arg5: memref<128x128xbf16, #tpu.memory_space<vmem>>, %arg6: memref<1x128xf32, #tpu.memory_space<vmem>>, %arg7: memref<1x144x128xf32, #tpu.memory_space<vmem>>) attributes {dimension_semantics = [#tpu.dimension_semantics<parallel>, #tpu.dimension_semantics<parallel>], iteration_bounds = array<i64: 2, 2>, scalar_prefetch = 0 : i64, scratch_operands = 0 : i64, tpu.core_type = #tpu.core_type<tc>, window_params = [{transform_indices = @transform_0, window_bounds = array<i64: 1, 1, 184, 8>}, {pipeline_mode = #tpu.pipeline_mode<synchronous>, transform_indices = @transform_1, window_bounds = array<i64: 9, 8, 128>}, {pipeline_mode = #tpu.pipeline_mode<synchronous>, transform_indices = @transform_2, window_bounds = array<i64: 1, 128>}, {pipeline_mode = #tpu.pipeline_mode<synchronous>, transform_indices = @transform_3, window_bounds = array<i64: 128, 128>}, {pipeline_mode = #tpu.pipeline_mode<synchronous>, transform_indices = @transform_4, window_bounds = array<i64: 1, 128>}, {transform_indices = @transform_5, window_bounds = array<i64: 1, 144, 128>}]} {
    %c0 = arith.constant 0 : index
    %c0_0 = arith.constant 0 : index
    %c0_1 = arith.constant 0 : index
    %c0_2 = arith.constant 0 : index
    %0 = vector.load %arg2[%c0, %c0_0, %c0_1, %c0_2] : memref<1x1x184x8xbf16, #tpu.memory_space<vmem>>, vector<1x1x184x8xbf16>
    %1 = vector.shape_cast %0 : vector<1x1x184x8xbf16> to vector<184x8xbf16>
    %cst = arith.constant 0.000000e+00 : f32
    %2 = vector.broadcast %cst : f32 to vector<144x128xf32>
    %3 = vector.extract_strided_slice %1 {offsets = [0, 0], sizes = [144, 8], strides = [1, 1]} : vector<184x8xbf16> to vector<144x8xbf16>
    %c0_3 = arith.constant 0 : index
    %c0_4 = arith.constant 0 : index
    %c0_5 = arith.constant 0 : index
    %4 = vector.load %arg3[%c0_3, %c0_4, %c0_5] : memref<9x8x128xbf16, #tpu.memory_space<vmem>>, vector<1x8x128xbf16>
    %5 = vector.shape_cast %4 : vector<1x8x128xbf16> to vector<8x128xbf16>
    %cst_6 = arith.constant dense<0.000000e+00> : vector<144x128xf32>
    %6 = tpu.matmul %3, %5, %cst_6 {dimension_numbers = #tpu.dot_dimension_numbers<[1], [0], [0], [1], [0, 0, 1, 1], [], []>} : vector<144x8xbf16>, vector<8x128xbf16>, vector<144x128xf32> -> vector<144x128xf32>
    %7 = arith.addf %2, %6 : vector<144x128xf32>
    %8 = vector.extract_strided_slice %1 {offsets = [1, 0], sizes = [144, 8], strides = [1, 1]} : vector<184x8xbf16> to vector<144x8xbf16>
    %c1 = arith.constant 1 : index
    %c0_7 = arith.constant 0 : index
    %c0_8 = arith.constant 0 : index
    %9 = vector.load %arg3[%c1, %c0_7, %c0_8] : memref<9x8x128xbf16, #tpu.memory_space<vmem>>, vector<1x8x128xbf16>
    %10 = vector.shape_cast %9 : vector<1x8x128xbf16> to vector<8x128xbf16>
    %cst_9 = arith.constant dense<0.000000e+00> : vector<144x128xf32>
    %11 = tpu.matmul %8, %10, %cst_9 {dimension_numbers = #tpu.dot_dimension_numbers<[1], [0], [0], [1], [0, 0, 1, 1], [], []>} : vector<144x8xbf16>, vector<8x128xbf16>, vector<144x128xf32> -> vector<144x128xf32>
    %12 = arith.addf %7, %11 : vector<144x128xf32>
    %13 = vector.extract_strided_slice %1 {offsets = [2, 0], sizes = [144, 8], strides = [1, 1]} : vector<184x8xbf16> to vector<144x8xbf16>
    %c2 = arith.constant 2 : index
    %c0_10 = arith.constant 0 : index
    %c0_11 = arith.constant 0 : index
    %14 = vector.load %arg3[%c2, %c0_10, %c0_11] : memref<9x8x128xbf16, #tpu.memory_space<vmem>>, vector<1x8x128xbf16>
    %15 = vector.shape_cast %14 : vector<1x8x128xbf16> to vector<8x128xbf16>
    %cst_12 = arith.constant dense<0.000000e+00> : vector<144x128xf32>
    %16 = tpu.matmul %13, %15, %cst_12 {dimension_numbers = #tpu.dot_dimension_numbers<[1], [0], [0], [1], [0, 0, 1, 1], [], []>} : vector<144x8xbf16>, vector<8x128xbf16>, vector<144x128xf32> -> vector<144x128xf32>
    %17 = arith.addf %12, %16 : vector<144x128xf32>
    %18 = vector.extract_strided_slice %1 {offsets = [18, 0], sizes = [144, 8], strides = [1, 1]} : vector<184x8xbf16> to vector<144x8xbf16>
    %c3 = arith.constant 3 : index
    %c0_13 = arith.constant 0 : index
    %c0_14 = arith.constant 0 : index
    %19 = vector.load %arg3[%c3, %c0_13, %c0_14] : memref<9x8x128xbf16, #tpu.memory_space<vmem>>, vector<1x8x128xbf16>
    %20 = vector.shape_cast %19 : vector<1x8x128xbf16> to vector<8x128xbf16>
    %cst_15 = arith.constant dense<0.000000e+00> : vector<144x128xf32>
    %21 = tpu.matmul %18, %20, %cst_15 {dimension_numbers = #tpu.dot_dimension_numbers<[1], [0], [0], [1], [0, 0, 1, 1], [], []>} : vector<144x8xbf16>, vector<8x128xbf16>, vector<144x128xf32> -> vector<144x128xf32>
    %22 = arith.addf %17, %21 : vector<144x128xf32>
    %23 = vector.extract_strided_slice %1 {offsets = [19, 0], sizes = [144, 8], strides = [1, 1]} : vector<184x8xbf16> to vector<144x8xbf16>
    %c4 = arith.constant 4 : index
    %c0_16 = arith.constant 0 : index
    %c0_17 = arith.constant 0 : index
    %24 = vector.load %arg3[%c4, %c0_16, %c0_17] : memref<9x8x128xbf16, #tpu.memory_space<vmem>>, vector<1x8x128xbf16>
    %25 = vector.shape_cast %24 : vector<1x8x128xbf16> to vector<8x128xbf16>
    %cst_18 = arith.constant dense<0.000000e+00> : vector<144x128xf32>
    %26 = tpu.matmul %23, %25, %cst_18 {dimension_numbers = #tpu.dot_dimension_numbers<[1], [0], [0], [1], [0, 0, 1, 1], [], []>} : vector<144x8xbf16>, vector<8x128xbf16>, vector<144x128xf32> -> vector<144x128xf32>
    %27 = arith.addf %22, %26 : vector<144x128xf32>
    %28 = vector.extract_strided_slice %1 {offsets = [20, 0], sizes = [144, 8], strides = [1, 1]} : vector<184x8xbf16> to vector<144x8xbf16>
    %c5 = arith.constant 5 : index
    %c0_19 = arith.constant 0 : index
    %c0_20 = arith.constant 0 : index
    %29 = vector.load %arg3[%c5, %c0_19, %c0_20] : memref<9x8x128xbf16, #tpu.memory_space<vmem>>, vector<1x8x128xbf16>
    %30 = vector.shape_cast %29 : vector<1x8x128xbf16> to vector<8x128xbf16>
    %cst_21 = arith.constant dense<0.000000e+00> : vector<144x128xf32>
    %31 = tpu.matmul %28, %30, %cst_21 {dimension_numbers = #tpu.dot_dimension_numbers<[1], [0], [0], [1], [0, 0, 1, 1], [], []>} : vector<144x8xbf16>, vector<8x128xbf16>, vector<144x128xf32> -> vector<144x128xf32>
    %32 = arith.addf %27, %31 : vector<144x128xf32>
    %33 = vector.extract_strided_slice %1 {offsets = [36, 0], sizes = [144, 8], strides = [1, 1]} : vector<184x8xbf16> to vector<144x8xbf16>
    %c6 = arith.constant 6 : index
    %c0_22 = arith.constant 0 : index
    %c0_23 = arith.constant 0 : index
    %34 = vector.load %arg3[%c6, %c0_22, %c0_23] : memref<9x8x128xbf16, #tpu.memory_space<vmem>>, vector<1x8x128xbf16>
    %35 = vector.shape_cast %34 : vector<1x8x128xbf16> to vector<8x128xbf16>
    %cst_24 = arith.constant dense<0.000000e+00> : vector<144x128xf32>
    %36 = tpu.matmul %33, %35, %cst_24 {dimension_numbers = #tpu.dot_dimension_numbers<[1], [0], [0], [1], [0, 0, 1, 1], [], []>} : vector<144x8xbf16>, vector<8x128xbf16>, vector<144x128xf32> -> vector<144x128xf32>
    %37 = arith.addf %32, %36 : vector<144x128xf32>
    %38 = vector.extract_strided_slice %1 {offsets = [37, 0], sizes = [144, 8], strides = [1, 1]} : vector<184x8xbf16> to vector<144x8xbf16>
    %c7 = arith.constant 7 : index
    %c0_25 = arith.constant 0 : index
    %c0_26 = arith.constant 0 : index
    %39 = vector.load %arg3[%c7, %c0_25, %c0_26] : memref<9x8x128xbf16, #tpu.memory_space<vmem>>, vector<1x8x128xbf16>
    %40 = vector.shape_cast %39 : vector<1x8x128xbf16> to vector<8x128xbf16>
    %cst_27 = arith.constant dense<0.000000e+00> : vector<144x128xf32>
    %41 = tpu.matmul %38, %40, %cst_27 {dimension_numbers = #tpu.dot_dimension_numbers<[1], [0], [0], [1], [0, 0, 1, 1], [], []>} : vector<144x8xbf16>, vector<8x128xbf16>, vector<144x128xf32> -> vector<144x128xf32>
    %42 = arith.addf %37, %41 : vector<144x128xf32>
    %43 = vector.extract_strided_slice %1 {offsets = [38, 0], sizes = [144, 8], strides = [1, 1]} : vector<184x8xbf16> to vector<144x8xbf16>
    %c8 = arith.constant 8 : index
    %c0_28 = arith.constant 0 : index
    %c0_29 = arith.constant 0 : index
    %44 = vector.load %arg3[%c8, %c0_28, %c0_29] : memref<9x8x128xbf16, #tpu.memory_space<vmem>>, vector<1x8x128xbf16>
    %45 = vector.shape_cast %44 : vector<1x8x128xbf16> to vector<8x128xbf16>
    %cst_30 = arith.constant dense<0.000000e+00> : vector<144x128xf32>
    %46 = tpu.matmul %43, %45, %cst_30 {dimension_numbers = #tpu.dot_dimension_numbers<[1], [0], [0], [1], [0, 0, 1, 1], [], []>} : vector<144x8xbf16>, vector<8x128xbf16>, vector<144x128xf32> -> vector<144x128xf32>
    %47 = arith.addf %42, %46 : vector<144x128xf32>
    %c0_31 = arith.constant 0 : index
    %c0_32 = arith.constant 0 : index
    %48 = vector.load %arg4[%c0_31, %c0_32] : memref<1x128xf32, #tpu.memory_space<vmem>>, vector<1x128xf32>
    %49 = vector.broadcast %48 : vector<1x128xf32> to vector<144x128xf32>
    %50 = arith.addf %47, %49 : vector<144x128xf32>
    %cst_33 = arith.constant 0.000000e+00 : f32
    %51 = vector.broadcast %cst_33 : f32 to vector<144x128xf32>
    %52 = arith.maximumf %50, %51 : vector<144x128xf32>
    %53 = arith.truncf %52 : vector<144x128xf32> to vector<144x128xbf16>
    %c0_34 = arith.constant 0 : index
    %c0_35 = arith.constant 0 : index
    %54 = vector.load %arg5[%c0_34, %c0_35] : memref<128x128xbf16, #tpu.memory_space<vmem>>, vector<128x128xbf16>
    %cst_36 = arith.constant dense<0.000000e+00> : vector<144x128xf32>
    %55 = tpu.matmul %53, %54, %cst_36 {dimension_numbers = #tpu.dot_dimension_numbers<[1], [0], [0], [1], [0, 0, 1, 1], [], []>} : vector<144x128xbf16>, vector<128x128xbf16>, vector<144x128xf32> -> vector<144x128xf32>
    %c0_37 = arith.constant 0 : index
    %c0_38 = arith.constant 0 : index
    %56 = vector.load %arg6[%c0_37, %c0_38] : memref<1x128xf32, #tpu.memory_space<vmem>>, vector<1x128xf32>
    %57 = vector.broadcast %56 : vector<1x128xf32> to vector<144x128xf32>
    %58 = arith.addf %55, %57 : vector<144x128xf32>
    %c0_39 = arith.constant 0 : index
    %c0_40 = arith.constant 0 : index
    %c0_41 = arith.constant 0 : index
    %59 = vector.load %arg7[%c0_39, %c0_40, %c0_41] : memref<1x144x128xf32, #tpu.memory_space<vmem>>, vector<1x144x128xf32>
    %60 = vector.shape_cast %59 : vector<1x144x128xf32> to vector<144x128xf32>
    %61 = vector.shape_cast %58 : vector<144x128xf32> to vector<1x144x128xf32>
    tpu.vector_store %arg7[%c0_39, %c0_40, %c0_41], %61 {strides = array<i32>} : memref<1x144x128xf32, #tpu.memory_space<vmem>>, vector<1x144x128xf32>,
    return
  }
  func.func @transform_0(%arg0: i32, %arg1: i32) -> (i32, i32, i32, i32) {
    %c0_i32 = arith.constant 0 : i32
    %c0_i32_0 = arith.constant 0 : i32
    %c0_i32_1 = arith.constant 0 : i32
    return %arg0, %arg1, %c0_i32, %c0_i32_0 : i32, i32, i32, i32
  }
  func.func @transform_1(%arg0: i32, %arg1: i32) -> (i32, i32, i32) {
    %c0_i32 = arith.constant 0 : i32
    %c0_i32_0 = arith.constant 0 : i32
    %c0_i32_1 = arith.constant 0 : i32
    %c0_i32_2 = arith.constant 0 : i32
    return %c0_i32, %c0_i32_0, %c0_i32_1 : i32, i32, i32
  }
  func.func @transform_2(%arg0: i32, %arg1: i32) -> (i32, i32) {
    %c0_i32 = arith.constant 0 : i32
    %c0_i32_0 = arith.constant 0 : i32
    %c0_i32_1 = arith.constant 0 : i32
    return %c0_i32, %c0_i32_0 : i32, i32
  }
  func.func @transform_3(%arg0: i32, %arg1: i32) -> (i32, i32) {
    %c0_i32 = arith.constant 0 : i32
    %c0_i32_0 = arith.constant 0 : i32
    %c0_i32_1 = arith.constant 0 : i32
    return %c0_i32, %c0_i32_0 : i32, i32
  }
  func.func @transform_4(%arg0: i32, %arg1: i32) -> (i32, i32) {
    %c0_i32 = arith.constant 0 : i32
    %c0_i32_0 = arith.constant 0 : i32
    %c0_i32_1 = arith.constant 0 : i32
    return %c0_i32, %c0_i32_0 : i32, i32
  }
  func.func @transform_5(%arg0: i32, %arg1: i32) -> (i32, i32, i32) {
    %c0_i32 = arith.constant 0 : i32
    %c0_i32_0 = arith.constant 0 : i32
    return %arg0, %arg1, %c0_i32 : i32, i32, i32
  }
}

</mosaic_0001>

<bundles_post_ra>
// kernel: tpu_custom_call.1
= control target key start
LH: loop header
LB: loop body
LE: loop exit
PB: predicated region body
PF: predicated region fallthrough
CT: control target
= control target key end

     0   :  { %10 = vsyncpa [#allocation3], 0  ;;  %s4164_s0 = inlined_call_operand.vmem [shape: bf16[2,2,184,8], index: 0, kind: input, shape index: {}]   ;;  %s4165_s1 = inlined_call_operand.vmem [shape: bf16[9,8,128], index: 1, kind: input, shape index: {}]   ;;  %s4166_s2 = inlined_call_operand.vmem [shape: f32[1,128], index: 2, kind: input, shape index: {}]   ;;  %s4167_s3 = inlined_call_operand.vmem [shape: bf16[128,128], index: 3, kind: input, shape index: {}]   ;;  %s4168_s4 = inlined_call_operand.vmem [shape: f32[1,128], index: 4, kind: input, shape index: {}]   ;;  %s4169_s5 = inlined_call_operand.hbm [shape: f32[2,288,128], index: 5, kind: output, shape index: {}]  }
   0x1   :  { %12 = vsyncpa [#allocation3 + $0x1], 0  ;;  %s3092_s18 = smov 0   ;;  %s3094_s19 = smov 0  }
   0x2   :  { %s3096_s20 = smov 0   ;;  %s3098_s21 = smov 0  }
   0x3   :  { %s3100_s22 = smov 0   ;;  %s3102_s23 = smov 0  }
   0x4   :  { %s3104_s24 = smov 0   ;;  %s3106_s25 = smov 0  }
   0x5 LB: > { %s2237_s26 = sadd.s32 4294967295, %s3055_s25   ;;  %s2238_s27 = sadd.s32 4294967294, %s3055_s25   ;;  %s3055_s25 = sphi %s3106_s25, %s18_s25   ;;  %s3051_s24 = sphi %s3104_s24, %s4178_s24   ;;  %s3047_s23 = sphi %s3102_s23, %s4177_s23   ;;  %s3043_s22 = sphi %s3100_s22, %s4176_s22   ;;  %s3039_s21 = sphi %s3098_s21, %s4175_s21   ;;  %s3035_s20 = sphi %s3096_s20, %s4174_s20   ;;  %s3031_s19 = sphi %s3094_s19, %s4173_s19   ;;  %s3027_s18 = sphi %s3092_s18, %s4172_s18  }
   0x6   : > { %s27_s28 = sadd.s32 1, %s3047_s23  ;;  %s30_s29 = sadd.s32 1, %s3051_s24 }
   0x7   : > { %p28_p0 = scmp.ge.s32.totalorder %s27_s28, 2  ;;  %p161_p1 = scmp.ne.s32.totalorder %s3035_s20, %s3031_s19 }
   0x8   : > { %p162_p2 = scmp.eq.s32.totalorder %s2237_s26, 3  ;;  %p167_p5 = scmp.ne.s32.totalorder %s3031_s19, %s3027_s18 }
   0x9   : > { %s4180_s28 = smov (%p28_p0, %s27_s28), 0  ;;  %s4182_s29 = smov (!%p28_p0, %s30_s29), %s3051_s24 }
   0xa   : > { %s147_s30 = ssub.s32 %s3047_s23, %s4180_s28  ;;  %p3143_p3 = por %p162_p2, %p161_p1 }
   0xb   : > { %p32_p4 = scmp.ge.s32.totalorder %s4182_s29, 2  ;;  %p168_p6 = scmp.eq.s32.totalorder %s2238_s27, 3 }
   0xc   : > { %p2241_p7 = scmp.ge.s32.totalorder %s3055_s25, 1  ;;  %p210_p9 = scmp.lt.s32.totalorder %s3055_s25, 5 }
   0xd   : > { %s4184_s29 = smov (%p32_p4, %s4182_s29), 0  ;;  %p3152_p8 = por %p168_p6, %p167_p5 }
   0xe   : > { %s146_s8 = ssub.s32 %s3051_s24, %s4184_s29  ;;  %s151_s9 = sadd.s32 1, %s3035_s20 }
   0xf   : > { %s148_s10 = sor.u32 %s147_s30, %s146_s8  ;;  %p211_p10 = pnand %p2241_p7, %p210_p9 }
  0x10   : > { %p149_p11 = scmp.eq.s32.totalorder %s148_s10, 0  ;;  %v2243_v0 = vld [vmem:[%s4165_s1 + $0x4] sm:$0xf] (!%p211_p10)  ;;  %vm432_vm0 = vcmask (!%p211_p10), 1043456   ;;  %v276_v1 = vld [vmem:[%s4165_s1] sm:$0xf] (!%p211_p10) }
  0x11   : > { %214 = sbr.rel (%p211_p10) target bundleno = 845 (0x34d), region = 40  ;;  %v3057_v2 = vmov (!%p211_p10), 0.0   ;;  %v434_v3 = vsel (!%p211_p10), %vm432_vm0, %v2243_v0, 0  ;;  %v560_v4 = vsel (!%p211_p10), %vm432_vm0, %v276_v1, 0  ;;  %p242_p12 = scmp.lt.s32.totalorder (!%p211_p10), %s3043_s22, 1  ;;  %vm3058_vm1 = vmmov (!%p211_p10), 0  }
  0x12   : > { %s3161_s11 = scalar_select %p149_p11, %s3035_s20, %s151_s9  }
  0x13   : > { %2466 = vmatprep.subr.bf16.mxu0 (!%p211_p10), %v3057_v2  ;;  %2504 = vmatprep.subr.bf16.mxu1 (!%p211_p10), %v3057_v2  ;;  %p244_p13 = scmp.lt.s32.totalorder (!%p211_p10), %s3039_s21, 1  ;;  %v2282_v5 = vld [vmem:[%s4165_s1 + $0xc] sm:$0xf] (!%p211_p10)  ;;  %vm404_vm2 = vcmask (!%p211_p10), 64512   ;;  %v2272_v15 = vld [vmem:[%s4165_s1 + $0x8] sm:$0xf] (!%p211_p10) }
  0x14   : > { %2467 = vmatpush3.bf16.msra.mxu0 (!%p211_p10), %v434_v3  ;;  %2505 = vmatpush3.bf16.msra.mxu1 (!%p211_p10), %v560_v4  ;;  %v861_v8 = vsel (!%p211_p10), %vm432_vm0, %v2282_v5, 0  ;;  %vm327_vm3 = vsmask.f32 (!%p211_p10), 7424  ;;  %v717_v19 = vsel (!%p211_p10), %vm432_vm0, %v2272_v15, 0  ;;  %vm669_vm4 = vcmask (!%p211_p10), 1046528   ;;  %s239_s8 = sand.u32 (!%p211_p10), 1, %s3031_s19  }
  0x15   : > { %2468 = vmatprep.mubr.msk.bf16.mxu0 (!%p211_p10), %vm3058_vm1, %v3057_v2  ;;  %2506 = vmatprep.mubr.msk.bf16.mxu1 (!%p211_p10), %vm3058_vm1, %v3057_v2  ;;  %vm1193_vm5 = vcmask (!%p211_p10), 1045504   ;;  %vm988_vm6 = vsmask.f32 (!%p211_p10), 6400  ;;  %vm1512_vm7 = vsmask.f32 (!%p211_p10), 5376  ;;  %vm1717_vm8 = vcmask (!%p211_p10), 1044480  }
  0x16   : > { %2542 = vmatprep.subr.bf16.mxu0 (!%p211_p10), %v3057_v2  ;;  %2580 = vmatprep.subr.bf16.mxu1 (!%p211_p10), %v3057_v2  ;;  %s2144_s15 = smul.u32 (!%p211_p10), 18, %s3039_s21  ;;  %s4112_s30 = scalar_lea.sflag (!%p211_p10), [#allocation3], %s239_s8 }
  0x18   : > { %s243_s16 = scalar_select %p242_p12, %s3043_s22, 1 }
  0x19   : > { %s245_s17 = scalar_select %p244_p13, %s3039_s21, 1 }
  0x1a   : > { %s2862_s26 = smul.u32 46, %s243_s16 }
  0x1b   : > { %s2861_s27 = smul.u32 23, %s245_s17 }
  0x1d   : > { %s248_s9 = sadd.s32 %s2862_s26, %s2861_s27 }
  0x1e   : > { %s2242_s10 = sshll.u32 %s248_s9, 2  ;;  %s2860_s9 = smul.u32 144, %s239_s8 }
  0x1f   : > { %s3189_s14 = scalar_lea.vmem %s4164_s0, %s2242_s10  ;;  %s3059_s10 = smov [#allocation2]  }
  0x20   : > { %v2939_v6 = vld [vmem:[%s3189_s14] sm:$0xff]   ;;  %v3193_v7 = vld [vmem:[%s3189_s14 + $0x8] sm:$0xff]   ;;  %v3199_v12 = vld [vmem:[%s3189_s14 + $0x10] sm:$0xff]   ;;  %s4063_s13 = scalar_lea.vmem [#allocation2], %s2860_s9  ;;  %s2965_s12 = sshll.u32 %s3059_s10, 4  ;;  %s2966_s12 = int_to_ptr.vmem [resolvable:$false] %s2965_s12 }
  0x21   : > { %v329_v9 = vshrl.u32 %v2939_v6, 16  ;;  %v331_v10 = vshll.u32 %v2939_v6, 16  ;;  %v336_v11 = vshll.u32 %v3193_v7, 16  ;;  %2507 = vmatmul.mubr.msk.bf16.vlgmr.msra.gmra.mrb[0].mxu1 %vm404_vm2, %v2939_v6  ;;  %v340_v17 = vshrl.u32 %v3193_v7, 16  ;;  %v3218_v23 = vld [vmem:[%s3189_s14 + $0x18] sm:$0xff]   ;;  %v3251_v35 = vld [vmem:[%s3189_s14 + $0x20] sm:$0xff]  }
  0x22   : > { %2510 = vmatprep.mubr.msk.bf16.mxu1 %vm3058_vm1, %v3057_v2  ;;  %2581 = vmatpush3.bf16.msra.mxu1 %v861_v8  ;;  %v3209_v18 = vshll.u32 %v3199_v12, 16  ;;  %v670_v24 = vrot.slane %v2939_v6, 1  ;;  %v3227_v26 = vshrl.u32 %v3199_v12, 16  ;;  %v3230_v27 = vshll.u32 %v3218_v23, 16  ;;  %v3234_v29 = vld [vmem:[%s3189_s14 + $0x48] sm:$0xf] }
  0x23   : > { %v333_v13 = vrot.slane %v331_v10, 1  ;;  %v338_v14 = vrot.slane %v336_v11, 1  ;;  %2656 = vmatprep.subr.bf16.mxu1 %v3057_v2  ;;  %v671_v28 = vrot.slane %v3193_v7, 1  ;;  %v3241_v31 = vrot.slane %v336_v11, 2  ;;  %v3254_v36 = vld [vmem:[%s3189_s14 + $0x40] sm:$0xff]   ;;  %v3284_v47 = vld [vmem:[%s3189_s14 + $0x28] sm:$0xff]  }
  0x24   : > { %v346_v22 = vrot.slane %v3209_v18, 1  ;;  %v3244_v32 = vrot.slane %v340_v17, 1  ;;  %v354_v34 = vrot.slane %v3230_v27, 1  ;;  %v2253_v37 = vcombine.low %v3234_v29, %v3234_v29  ;;  %v3303_v53 = vld [vmem:[%s3189_s14 + $0x30] sm:$0xff]   ;;  %v3322_v59 = vld [vmem:[%s3189_s14 + $0x38] sm:$0xff]   ;;  %s2152_s26 = sshll.u32 %s4063_s13, 4  ;;  %s4105_s26 = int_to_ptr.vmem [resolvable:$true] %s2152_s26 }
  0x25   : > { %v334_v16 = vor.u32 %v333_v13, %v329_v9  ;;  %v342_v21 = vor.u32 %v340_v17, %v338_v14  ;;  %v3239_v30 = vsel %vm669_vm4, %v670_v24, %v671_v28  ;;  %v3263_v38 = vrot.slane %v3254_v36, 1  ;;  %s2961_s9 = scalar_lea.vmem %s4105_s26, 2304  ;;  %p2968_p4 = scmp.lt.s32.totalorder %s4105_s26, %s2966_s12 }
  0x26   : > { %v350_v33 = vor.u32 %v3227_v26, %v346_v22  ;;  %v687_v39 = vrot.slane %v2253_v37, 1  ;;  %v3266_v40 = vshrl.u32 %v3218_v23, 16  ;;  %v3270_v42 = vshll.u32 %v3251_v35, 16  ;;  %p2962_p0 = scmp.ne.s32.totalorder %s4105_s26, %s2961_s9 }
  0x27   : > { %v339_v20 = vsel %vm327_vm3, %v334_v16, %v338_v14  ;;  %v347_v25 = vsel %vm327_vm3, %v342_v21, %v346_v22  ;;  %v991_v44 = vor.u32 %v3241_v31, %v3244_v32  ;;  %v3292_v49 = vshrl.u32 %v3251_v35, 16  ;;  %v2304_v16 = vld [vmem:[%s4165_s1 + $0x14] sm:$0xf] }
  0x28   : > { %2469 = vmatmul.mubr.msk.bf16.vlgmr.msra.gmra.mrb[0].mxu0 %vm404_vm2, %v339_v20  ;;  %v355_v41 = vsel %vm327_vm3, %v350_v33, %v354_v34  ;;  %v3274_v43 = vsel %vm669_vm4, %v3263_v38, %v687_v39  ;;  %v358_v45 = vor.u32 %v3266_v40, %v354_v34  ;;  %v362_v46 = vrot.slane %v3270_v42, 1  ;;  %v2294_v20 = vld [vmem:[%s4165_s1 + $0x10] sm:$0xf]  ;;  %p2963_p1 = pnand %p2962_p0, %p3143_p3 }
  0x29   : > { %2543 = vmatpush3.bf16.msra.mxu0 %v717_v19  ;;  %2472 = vmatprep.mubr.msk.bf16.mxu0 %vm3058_vm1, %v3057_v2  ;;  %v3295_v50 = vshll.u32 %v3284_v47, 16  ;;  %v3311_v55 = vshrl.u32 %v3284_v47, 16  ;;  %v3314_v56 = vshll.u32 %v3303_v53, 16  ;;  %v3330_v61 = vshrl.u32 %v3303_v53, 16 }
  0x2a   : > { %2511 = vmatmul.mubr.msk.bf16.gmra.mrb[4].mxu1 %vm404_vm2, %v3193_v7  ;;  %2618 = vmatprep.subr.bf16.mxu0 %v3057_v2  ;;  %v363_v48 = vsel %vm327_vm3, %v358_v45, %v362_v46  ;;  %v366_v51 = vor.u32 %v3292_v49, %v362_v46  ;;  %v3333_v62 = vshll.u32 %v3322_v59, 16  ;;  %v3346_v3 = vshrl.u32 %v3322_v59, 16  ;;  %v272_v45 = vld [vmem:[%s3189_s14 + $0x4c] sm:$0xf]  ;;  %p2964_p2 = pneg %p2963_p1 }
  0x2b   : > { %2514 = vmatprep.mubr.msk.bf16.mxu1 %vm3058_vm1, %v3057_v2  ;;  %v370_v52 = vrot.slane %v3295_v50, 1  ;;  %v378_v58 = vrot.slane %v3314_v56, 1  ;;  %v3349_v4 = vshll.u32 %v3254_v36, 16  ;;  %v3362_v9 = vshrl.u32 %v3254_v36, 16 }
  0x2c   : > { %v386_v0 = vrot.slane %v3333_v62, 1  ;;  %v400_v10 = vshll.u32 %v2253_v37, 16  ;;  %v673_v14 = vrot.slane %v3199_v12, 1  ;;  %v1241_v19 = vsel %vm432_vm0, %v2304_v16, 0 }
  0x2d   : > { %v371_v54 = vsel %vm327_vm3, %v366_v51, %v370_v52  ;;  %v374_v57 = vor.u32 %v3311_v55, %v370_v52  ;;  %v382_v63 = vor.u32 %v3330_v61, %v378_v58  ;;  %v394_v6 = vrot.slane %v3349_v4, 1  ;;  %v3448_v52 = vld [vmem:[%s3189_s14 + $0x50] sm:$0xf] }
  0x2e   : > { %v390_v5 = vor.u32 %v3346_v3, %v386_v0  ;;  %v402_v13 = vrot.slane %v400_v10, 1  ;;  %v674_v17 = vsel %vm669_vm4, %v671_v28, %v673_v14  ;;  %v675_v21 = vrot.slane %v3218_v23, 1 }
  0x2f   : > { %v379_v60 = vsel %vm327_vm3, %v374_v57, %v378_v58  ;;  %v387_v1 = vsel %vm327_vm3, %v382_v63, %v386_v0  ;;  %v398_v11 = vor.u32 %v3362_v9, %v394_v6  ;;  %v1066_v22 = vsel %vm432_vm0, %v2294_v20, 0 }
  0x30   : > { %2473 = vmatmul.mubr.msk.bf16.gmra.mrb[4].mxu0 %vm404_vm2, %v347_v25  ;;  %v395_v8 = vsel %vm327_vm3, %v390_v5, %v394_v6  ;;  %v676_v24 = vsel %vm669_vm4, %v673_v14, %v675_v21  ;;  %v677_v25 = vrot.slane %v3251_v35, 1  ;;  %v681_v34 = vrot.slane %v3303_v53, 1 }
  0x31   : > { %2476 = vmatprep.mubr.msk.bf16.mxu0 %vm3058_vm1, %v3057_v2  ;;  %v403_v15 = vsel %vm327_vm3, %v398_v11, %v402_v13  ;;  %v683_v39 = vrot.slane %v3322_v59, 1  ;;  %v3436_v46 = vcombine.low %v3234_v29, %v272_v45  ;;  %v992_v63 = vrot.slane %v3227_v26, 1 }
  0x32   : > { %2515 = vmatmul.mubr.msk.bf16.gmra.mrb[8].mxu1 %vm404_vm2, %v3199_v12  ;;  %v678_v28 = vsel %vm669_vm4, %v675_v21, %v677_v25  ;;  %v993_v0 = vrot.slane %v3209_v18, 2  ;;  %v1197_v10 = vrot.slane %v3218_v23, 2  ;;  %v996_v11 = vrot.slane %v3266_v40, 1 }
  0x33   : > { %2518 = vmatprep.mubr.msk.bf16.mxu1 %vm3058_vm1, %v3057_v2  ;;  %v850_v51 = vrot.slane %v3436_v46, 1  ;;  %v997_v13 = vrot.slane %v3230_v27, 2  ;;  %v1199_v31 = vrot.slane %v3251_v35, 2  ;;  %v1201_v21 = vrot.slane %v3284_v47, 2 }
  0x35   : > { %v851_v29 = vsel %vm669_vm4, %v3263_v38, %v850_v51  ;;  %v998_v16 = vor.u32 %v997_v13, %v996_v11 }
  0x38   : > { %2477 = vmatmul.mubr.msk.bf16.gmra.mrb[8].mxu0 %vm404_vm2, %v355_v41  ;;  %v684_v41 = vsel %vm669_vm4, %v681_v34, %v683_v39 }
  0x39   : > { %2480 = vmatprep.mubr.msk.bf16.mxu0 %vm3058_vm1, %v3057_v2 }
  0x3a   : > { %2519 = vmatmul.mubr.msk.bf16.gmra.mrb[12].mxu1 %vm404_vm2, %v3218_v23 }
  0x3b   : > { %2522 = vmatprep.mubr.msk.bf16.mxu1 %vm3058_vm1, %v3057_v2 }
  0x40   : > { %2481 = vmatmul.mubr.msk.bf16.gmra.mrb[12].mxu0 %vm404_vm2, %v363_v48  ;;  %v686_v48 = vsel %vm669_vm4, %v683_v39, %v3263_v38  ;;  %v1194_v38 = vrot.slane %v3193_v7, 2  ;;  %v994_v7 = vor.u32 %v993_v0, %v992_v63  ;;  %v1009_v39 = vrot.slane %v3314_v56, 2 }
  0x41   : > { %2484 = vmatprep.mubr.msk.bf16.mxu0 %vm3058_vm1, %v3057_v2  ;;  %v1016_v0 = vrot.slane %v3362_v9, 1 }
  0x42   : > { %2523 = vmatmul.mubr.msk.bf16.gmra.mrb[16].mxu1 %vm404_vm2, %v3251_v35  ;;  %v999_v32 = vsel %vm988_vm6, %v994_v7, %v998_v16 }
  0x43   : > { %2526 = vmatprep.mubr.msk.bf16.mxu1 %vm3058_vm1, %v3057_v2 }
  0x48   : > { %2485 = vmatmul.mubr.msk.bf16.gmra.mrb[16].mxu0 %vm404_vm2, %v371_v54  ;;  %v3454_v54 = vcombine.low %v3448_v52, %v3448_v52 }
  0x49   : > { %2488 = vmatprep.mubr.msk.bf16.mxu0 %vm3058_vm1, %v3057_v2 }
  0x4a   : > { %2527 = vmatmul.mubr.msk.bf16.gmra.mrb[20].mxu1 %vm404_vm2, %v3284_v47  ;;  %v852_v57 = vrot.slane %v3454_v54, 1 }
  0x4b   : > { %2530 = vmatprep.mubr.msk.bf16.mxu1 %vm3058_vm1, %v3057_v2 }
  0x4c   : > { %v853_v58 = vsel %vm669_vm4, %v850_v51, %v852_v57  ;;  %v1013_v57 = vrot.slane %v3333_v62, 2 }
  0x50   : > { %2489 = vmatmul.mubr.msk.bf16.gmra.mrb[20].mxu0 %vm404_vm2, %v379_v60  ;;  %v1195_v60 = vrot.slane %v3199_v12, 2 }
  0x51   : > { %2492 = vmatprep.mubr.msk.bf16.mxu0 %vm3058_vm1, %v3057_v2 }
  0x52   : > { %2531 = vmatmul.mubr.msk.bf16.gmra.mrb[24].mxu1 %vm404_vm2, %v3303_v53  ;;  %v1196_v5 = vsel %vm1193_vm5, %v1194_v38, %v1195_v60 }
  0x53   : > { %2534 = vmatprep.mubr.msk.bf16.mxu1 %vm3058_vm1, %v3057_v2 }
  0x58   : > { %2493 = vmatmul.mubr.msk.bf16.gmra.mrb[24].mxu0 %vm404_vm2, %v387_v1  ;;  %v2326_v1 = vld [vmem:[%s4165_s1 + $0x1c] sm:$0xf] }
  0x59   : > { %2496 = vmatprep.mubr.msk.bf16.mxu0 %vm3058_vm1, %v3057_v2  ;;  %v1590_v6 = vsel %vm432_vm0, %v2326_v1, 0  ;;  %v1017_v1 = vrot.slane %v3349_v4, 2 }
  0x5a   : > { %2535 = vmatmul.mubr.msk.bf16.gmra.mrb[28].mxu1 %vm404_vm2, %v3322_v59 }
  0x5b   : > { %2538 = vmatprep.mubr.msk.bf16.mxu1 %vm3058_vm1, %v3057_v2 }
  0x60   : > { %2497 = vmatmul.mubr.msk.bf16.gmra.mrb[28].mxu0 %vm404_vm2, %v395_v8  ;;  %v2314_v8 = vld [vmem:[%s4165_s1 + $0x18] sm:$0xf] }
  0x61   : > { %2500 = vmatprep.mubr.msk.bf16.mxu0 %vm3058_vm1, %v3057_v2  ;;  %v1385_v14 = vsel %vm432_vm0, %v2314_v8, 0  ;;  %v1024_v8 = vshll.u32 %v3436_v46, 16 }
  0x62   : > { %2539 = vmatmul.mubr.msk.bf16.gmra.mrb[32].mxu1 %vm404_vm2, %v3254_v36 }
  0x63   : > { %2582 = vmatprep.mubr.msk.bf16.mxu1 %vm3058_vm1, %v3057_v2  ;;  %v1026_v13 = vrot.slane %v1024_v8, 2 }
  0x68   : > { %2501 = vmatmul.mubr.msk.bf16.gmra.mrb[32].mxu0 %vm404_vm2, %v403_v15  ;;  %v3499_v15 = vsel %vm1193_vm5, %v1195_v60, %v1197_v10  ;;  %v1207_v60 = vrot.slane %v3254_v36, 2 }
  0x69   : > { %2544 = vmatprep.mubr.msk.bf16.mxu0 %vm3058_vm1, %v3057_v2 }
  0x6a   : > { %2583 = vmatmul.mubr.msk.bf16.vlgmr.msra.gmra.mrb[36].mxu1 %vm404_vm2, %v674_v17 }
  0x6b   : > { %2586 = vmatprep.mubr.msk.bf16.mxu1 %vm3058_vm1, %v3057_v2  ;;  %2657 = vmatpush3.bf16.msra.mxu1 %v1241_v19  ;;  %v3514_v19 = vsel %vm1193_vm5, %v1197_v10, %v1199_v31  ;;  %v3582_v10 = vrot.slane %v3436_v46, 2 }
  0x6c   : > { %2732 = vmatprep.subr.bf16.mxu1 %v3057_v2 }
  0x70   : > { %2545 = vmatmul.mubr.msk.bf16.vlgmr.msra.gmra.mrb[36].mxu0 %vm404_vm2, %v3239_v30  ;;  %v679_v30 = vrot.slane %v3284_v47, 1 }
  0x71   : > { %2619 = vmatpush3.bf16.msra.mxu0 %v1066_v22  ;;  %2548 = vmatprep.mubr.msk.bf16.mxu0 %vm3058_vm1, %v3057_v2 }
  0x72   : > { %2587 = vmatmul.mubr.msk.bf16.gmra.mrb[40].mxu1 %vm404_vm2, %v676_v24  ;;  %2694 = vmatprep.subr.bf16.mxu0 %v3057_v2  ;;  %v680_v33 = vsel %vm669_vm4, %v677_v25, %v679_v30  ;;  %v682_v37 = vsel %vm669_vm4, %v679_v30, %v681_v34  ;;  %v1005_v25 = vrot.slane %v3295_v50, 2 }
  0x73   : > { %2590 = vmatprep.mubr.msk.bf16.mxu1 %vm3058_vm1, %v3057_v2 }
  0x78   : > { %2549 = vmatmul.mubr.msk.bf16.gmra.mrb[40].mxu0 %vm404_vm2, %v674_v17  ;;  %v1001_v17 = vrot.slane %v3270_v42, 2 }
  0x79   : > { %2552 = vmatprep.mubr.msk.bf16.mxu0 %vm3058_vm1, %v3057_v2 }
  0x7a   : > { %2591 = vmatmul.mubr.msk.bf16.gmra.mrb[44].mxu1 %vm404_vm2, %v678_v28 }
  0x7b   : > { %2594 = vmatprep.mubr.msk.bf16.mxu1 %vm3058_vm1, %v3057_v2 }
  0x80   : > { %2553 = vmatmul.mubr.msk.bf16.gmra.mrb[44].mxu0 %vm404_vm2, %v676_v24  ;;  %v1004_v24 = vrot.slane %v3311_v55, 1 }
  0x81   : > { %2556 = vmatprep.mubr.msk.bf16.mxu0 %vm3058_vm1, %v3057_v2 }
  0x82   : > { %2595 = vmatmul.mubr.msk.bf16.gmra.mrb[48].mxu1 %vm404_vm2, %v680_v33  ;;  %v1006_v30 = vor.u32 %v1005_v25, %v1004_v24  ;;  %v1513_v24 = vrot.slane %v3227_v26, 2  ;;  %v1514_v25 = vrot.slane %v3209_v18, 3 }
  0x83   : > { %2598 = vmatprep.mubr.msk.bf16.mxu1 %vm3058_vm1, %v3057_v2 }
  0x88   : > { %2557 = vmatmul.mubr.msk.bf16.gmra.mrb[48].mxu0 %vm404_vm2, %v678_v28  ;;  %v3528_v28 = vsel %vm1193_vm5, %v1199_v31, %v1201_v21  ;;  %v1030_v31 = vshrl.u32 %v3454_v54, 16 }
  0x89   : > { %2560 = vmatprep.mubr.msk.bf16.mxu0 %vm3058_vm1, %v3057_v2 }
  0x8a   : > { %2599 = vmatmul.mubr.msk.bf16.gmra.mrb[52].mxu1 %vm404_vm2, %v682_v37 }
  0x8b   : > { %2602 = vmatprep.mubr.msk.bf16.mxu1 %vm3058_vm1, %v3057_v2 }
  0x90   : > { %2561 = vmatmul.mubr.msk.bf16.gmra.mrb[52].mxu0 %vm404_vm2, %v680_v33  ;;  %v1203_v33 = vrot.slane %v3303_v53, 2 }
  0x91   : > { %2564 = vmatprep.mubr.msk.bf16.mxu0 %vm3058_vm1, %v3057_v2 }
  0x92   : > { %2603 = vmatmul.mubr.msk.bf16.gmra.mrb[56].mxu1 %vm404_vm2, %v684_v41 }
  0x93   : > { %2606 = vmatprep.mubr.msk.bf16.mxu1 %vm3058_vm1, %v3057_v2 }
  0x98   : > { %2565 = vmatmul.mubr.msk.bf16.gmra.mrb[56].mxu0 %vm404_vm2, %v682_v37  ;;  %v1008_v37 = vrot.slane %v3330_v61, 1 }
  0x99   : > { %2568 = vmatprep.mubr.msk.bf16.mxu0 %vm3058_vm1, %v3057_v2 }
  0x9a   : > { %2607 = vmatmul.mubr.msk.bf16.gmra.mrb[60].mxu1 %vm404_vm2, %v686_v48  ;;  %v1010_v45 = vor.u32 %v1009_v39, %v1008_v37 }
  0x9b   : > { %2610 = vmatprep.mubr.msk.bf16.mxu1 %vm3058_vm1, %v3057_v2 }
  0x9c   : > { %v1011_v51 = vsel %vm988_vm6, %v1006_v30, %v1010_v45 }
  0xa0   : > { %2569 = vmatmul.mubr.msk.bf16.gmra.mrb[60].mxu0 %vm404_vm2, %v684_v41  ;;  %v3542_v41 = vsel %vm1193_vm5, %v1201_v21, %v1203_v33 }
  0xa1   : > { %2572 = vmatprep.mubr.msk.bf16.mxu0 %vm3058_vm1, %v3057_v2 }
  0xa2   : > { %2611 = vmatmul.mubr.msk.bf16.gmra.mrb[64].mxu1 %vm404_vm2, %v851_v29  ;;  %v1012_v29 = vrot.slane %v3346_v3, 1 }
  0xa3   : > { %2614 = vmatprep.mubr.msk.bf16.mxu1 %vm3058_vm1, %v3057_v2 }
  0xa4   : > { %v1014_v38 = vor.u32 %v1013_v57, %v1012_v29  ;;  %v2336_v57 = vld [vmem:[%s4165_s1 + $0x20] sm:$0xf] }
  0xa6   : > { %v1015_v63 = vsel %vm988_vm6, %v1010_v45, %v1014_v38 }
  0xa8   : > { %2573 = vmatmul.mubr.msk.bf16.gmra.mrb[64].mxu0 %vm404_vm2, %v686_v48  ;;  %v1205_v48 = vrot.slane %v3322_v59, 2 }
  0xa9   : > { %2576 = vmatprep.mubr.msk.bf16.mxu0 %vm3058_vm1, %v3057_v2 }
  0xaa   : > { %2615 = vmatmul.mubr.msk.bf16.gmra.mrb[68].mxu1 %vm404_vm2, %v853_v58  ;;  %v3556_v58 = vsel %vm1193_vm5, %v1203_v33, %v1205_v48  ;;  %v1517_v33 = vrot.slane %v3230_v27, 3 }
  0xab   : > { %2658 = vmatprep.mubr.msk.bf16.mxu1 %vm3058_vm1, %v3057_v2 }
  0xb0   : > { %2577 = vmatmul.mubr.msk.bf16.gmra.mrb[68].mxu0 %vm404_vm2, %v3274_v43  ;;  %v995_v43 = vsel %vm988_vm6, %v991_v44, %v994_v7  ;;  %v1000_v44 = vrot.slane %v3292_v49, 1  ;;  %v1021_v7 = vshrl.u32 %v3436_v46, 16 }
  0xb1   : > { %2620 = vmatprep.mubr.msk.bf16.mxu0 %vm3058_vm1, %v3057_v2 }
  0xb2   : > { %2659 = vmatmul.mubr.msk.bf16.vlgmr.msra.gmra.mrb[72].mxu1 %vm404_vm2, %v1196_v5  ;;  %v1002_v20 = vor.u32 %v1001_v17, %v1000_v44  ;;  %v3570_v5 = vsel %vm1193_vm5, %v1205_v48, %v1207_v60  ;;  %v1023_v11 = vrot.slane %v1021_v7, 1  ;;  %v1211_v44 = vrot.slane %v3454_v54, 2 }
  0xb3   : > { %2662 = vmatprep.mubr.msk.bf16.mxu1 %vm3058_vm1, %v3057_v2  ;;  %2733 = vmatpush3.bf16.msra.mxu1 %v1590_v6  ;;  %v1018_v6 = vor.u32 %v1017_v1, %v1016_v0  ;;  %v1520_v48 = vrot.slane %v3292_v49, 2 }
  0xb4   : > { %2808 = vmatprep.subr.bf16.mxu1 %v3057_v2  ;;  %v1003_v22 = vsel %vm988_vm6, %v998_v16, %v1002_v20  ;;  %v1007_v34 = vsel %vm988_vm6, %v1002_v20, %v1006_v30  ;;  %v1027_v16 = vor.u32 %v1026_v13, %v1023_v11  ;;  %v1032_v20 = vrot.slane %v1030_v31, 1 }
  0xb5   : > { %v1516_v30 = vrot.slane %v3266_v40, 2  ;;  %v1525_v31 = vrot.slane %v3295_v50, 3 }
  0xb6   : > { %v1028_v17 = vsel %vm988_vm6, %v1018_v6, %v1027_v16 }
  0xb7   : > { %v1518_v37 = vor.u32 %v1517_v33, %v1516_v30  ;;  %v1528_v33 = vrot.slane %v3330_v61, 2 }
  0xb8   : > { %2621 = vmatmul.mubr.msk.bf16.vlgmr.msra.gmra.mrb[72].mxu0 %vm404_vm2, %v995_v43  ;;  %v1019_v43 = vsel %vm988_vm6, %v1014_v38, %v1018_v6  ;;  %v1765_v6 = vsel %vm432_vm0, %v2336_v57, 0 }
  0xb9   : > { %2695 = vmatpush3.bf16.msra.mxu0 %v1385_v14  ;;  %2624 = vmatprep.mubr.msk.bf16.mxu0 %vm3058_vm1, %v3057_v2  ;;  %v3591_v14 = vsel %vm1193_vm5, %v1207_v60, %v3582_v10 }
  0xba   : > { %2663 = vmatmul.mubr.msk.bf16.gmra.mrb[76].mxu1 %vm404_vm2, %v3499_v15  ;;  %2770 = vmatprep.subr.bf16.mxu0 %v3057_v2 }
  0xbb   : > { %2666 = vmatprep.mubr.msk.bf16.mxu1 %vm3058_vm1, %v3057_v2 }
  0xc0   : > { %2625 = vmatmul.mubr.msk.bf16.gmra.mrb[76].mxu0 %vm404_vm2, %v999_v32  ;;  %v1033_v32 = vshll.u32 %v3454_v54, 16 }
  0xc1   : > { %2628 = vmatprep.mubr.msk.bf16.mxu0 %vm3058_vm1, %v3057_v2 }
  0xc2   : > { %2667 = vmatmul.mubr.msk.bf16.gmra.mrb[80].mxu1 %vm404_vm2, %v3514_v19  ;;  %v1035_v21 = vrot.slane %v1033_v32, 2 }
  0xc3   : > { %2670 = vmatprep.mubr.msk.bf16.mxu1 %vm3058_vm1, %v3057_v2 }
  0xc4   : > { %v1036_v54 = vor.u32 %v1035_v21, %v1032_v20 }
  0xc6   : > { %v1037_v18 = vsel %vm988_vm6, %v1027_v16, %v1036_v54  ;;  %v1524_v16 = vrot.slane %v3311_v55, 2  ;;  %v1529_v54 = vrot.slane %v3314_v56, 3 }
  0xc8   : > { %2629 = vmatmul.mubr.msk.bf16.gmra.mrb[80].mxu0 %vm404_vm2, %v1003_v22  ;;  %v1212_v22 = vsel %vm1193_vm5, %v3582_v10, %v1211_v44 }
  0xc9   : > { %2632 = vmatprep.mubr.msk.bf16.mxu0 %vm3058_vm1, %v3057_v2 }
  0xca   : > { %2671 = vmatmul.mubr.msk.bf16.gmra.mrb[84].mxu1 %vm404_vm2, %v3528_v28 }
  0xcb   : > { %2674 = vmatprep.mubr.msk.bf16.mxu1 %vm3058_vm1, %v3057_v2 }
  0xd0   : > { %2633 = vmatmul.mubr.msk.bf16.gmra.mrb[84].mxu0 %vm404_vm2, %v1007_v34  ;;  %v1515_v34 = vor.u32 %v1514_v25, %v1513_v24 }
  0xd1   : > { %2636 = vmatprep.mubr.msk.bf16.mxu0 %vm3058_vm1, %v3057_v2 }
  0xd2   : > { %2675 = vmatmul.mubr.msk.bf16.gmra.mrb[88].mxu1 %vm404_vm2, %v3542_v41  ;;  %v1519_v45 = vsel %vm1512_vm7, %v1515_v34, %v1518_v37 }
  0xd3   : > { %2678 = vmatprep.mubr.msk.bf16.mxu1 %vm3058_vm1, %v3057_v2 }
  0xd8   : > { %2637 = vmatmul.mubr.msk.bf16.gmra.mrb[88].mxu0 %vm404_vm2, %v1011_v51  ;;  %v1521_v51 = vrot.slane %v3270_v42, 3 }
  0xd9   : > { %2640 = vmatprep.mubr.msk.bf16.mxu0 %vm3058_vm1, %v3057_v2 }
  0xda   : > { %2679 = vmatmul.mubr.msk.bf16.gmra.mrb[92].mxu1 %vm404_vm2, %v3556_v58  ;;  %v1522_v38 = vor.u32 %v1521_v51, %v1520_v48  ;;  %v1532_v51 = vrot.slane %v3346_v3, 2 }
  0xdb   : > { %2682 = vmatprep.mubr.msk.bf16.mxu1 %vm3058_vm1, %v3057_v2 }
  0xdc   : > { %v1523_v13 = vsel %vm1512_vm7, %v1518_v37, %v1522_v38 }
  0xe0   : > { %2641 = vmatmul.mubr.msk.bf16.gmra.mrb[92].mxu0 %vm404_vm2, %v1015_v63 }
  0xe1   : > { %2644 = vmatprep.mubr.msk.bf16.mxu0 %vm3058_vm1, %v3057_v2 }
  0xe2   : > { %2683 = vmatmul.mubr.msk.bf16.gmra.mrb[96].mxu1 %vm404_vm2, %v3570_v5 }
  0xe3   : > { %2686 = vmatprep.mubr.msk.bf16.mxu1 %vm3058_vm1, %v3057_v2 }
  0xe8   : > { %2645 = vmatmul.mubr.msk.bf16.gmra.mrb[96].mxu0 %vm404_vm2, %v1019_v43 }
  0xe9   : > { %2648 = vmatprep.mubr.msk.bf16.mxu0 %vm3058_vm1, %v3057_v2 }
  0xea   : > { %2687 = vmatmul.mubr.msk.bf16.gmra.mrb[100].mxu1 %vm404_vm2, %v3591_v14 }
  0xeb   : > { %2690 = vmatprep.mubr.msk.bf16.mxu1 %vm3058_vm1, %v3057_v2 }
  0xf0   : > { %2649 = vmatmul.mubr.msk.bf16.gmra.mrb[100].mxu0 %vm404_vm2, %v1028_v17  ;;  %v1526_v17 = vor.u32 %v1525_v31, %v1524_v16  ;;  %v1537_v16 = vrot.slane %v3349_v4, 3 }
  0xf1   : > { %2652 = vmatprep.mubr.msk.bf16.mxu0 %vm3058_vm1, %v3057_v2 }
  0xf2   : > { %2691 = vmatmul.mubr.msk.bf16.gmra.mrb[104].mxu1 %vm404_vm2, %v1212_v22  ;;  %v1527_v30 = vsel %vm1512_vm7, %v1522_v38, %v1526_v17 }
  0xf3   : > { %2734 = vmatprep.mubr.msk.bf16.mxu1 %vm3058_vm1, %v3057_v2 }
  0xf4   : > { %v596_v26 = vpop.f32.mrb[0].mxu1 }
  0xf5   : > { %v2508_v40 = vpop.f32.mrb[1].mxu1 }
  0xf6   : > { %v599_v39 = vpop.f32.mrb[2].mxu1 }
  0xf7   : > { %v2509_v27 = vpop.f32.mrb[3].mxu1 }
  0xf8   : > { %2653 = vmatmul.mubr.msk.bf16.gmra.mrb[104].mxu0 %vm404_vm2, %v1037_v18 }
  0xf9   : > { %2696 = vmatprep.mubr.msk.bf16.mxu0 %vm3058_vm1, %v3057_v2 }
  0xfa   : > { %2735 = vmatmul.mubr.msk.bf16.vlgmr.msra.gmra.mrb[108].mxu1 %vm404_vm2, %v1519_v45 }
  0xfb   : > { %v470_v29 = vpop.f32.mrb[0].mxu0  ;;  %2738 = vmatprep.mubr.msk.bf16.mxu1 %vm3058_vm1, %v3057_v2 }
  0xfc   : > { %v3629_v60 = vadd.f32 %v596_v26, %v470_v29  ;;  %v2470_v49 = vpop.f32.mrb[1].mxu0  ;;  %v1530_v26 = vor.u32 %v1529_v54, %v1528_v33  ;;  %v1533_v29 = vrot.slane %v3333_v62, 3  ;;  %v1541_v33 = vrot.slane %v1024_v8, 3 }
  0xfd   : > { %v473_v42 = vpop.f32.mrb[2].mxu0  ;;  %v604_v63 = vpop.f32.mrb[4].mxu1 }
  0xfe   : > { %v3631_v0 = vadd.f32 %v599_v39, %v473_v42  ;;  %v2471_v1 = vpop.f32.mrb[3].mxu0  ;;  %v2512_v43 = vpop.f32.mrb[5].mxu1  ;;  %v1531_v48 = vsel %vm1512_vm7, %v1526_v17, %v1530_v26  ;;  %v1534_v49 = vor.u32 %v1533_v29, %v1532_v51 }
  0xff   : > { %v607_v11 = vpop.f32.mrb[6].mxu1 }
 0x100   : > { %2697 = vmatmul.mubr.msk.bf16.vlgmr.msra.gmra.mrb[108].mxu0 %vm404_vm2, %v3499_v15  ;;  %v2513_v32 = vpop.f32.mrb[7].mxu1 }
 0x101   : > { %2771 = vmatpush3.bf16.msra.mxu0 %v1765_v6  ;;  %2700 = vmatprep.mubr.msk.bf16.mxu0 %vm3058_vm1, %v3057_v2 }
 0x102   : > { %2739 = vmatmul.mubr.msk.bf16.gmra.mrb[112].mxu1 %vm404_vm2, %v1523_v13  ;;  %v1536_v13 = vrot.slane %v3362_v9, 2  ;;  %v274_v9 = vld [vmem:[%s3189_s14 + $0x54] sm:$0xf] }
 0x103   : > { %v478_v44 = vpop.f32.mrb[4].mxu0  ;;  %2742 = vmatprep.mubr.msk.bf16.mxu1 %vm3058_vm1, %v3057_v2  ;;  %v3697_v54 = vcombine.low %v3448_v52, %v274_v9 }
 0x104   : > { %v3644_v20 = vadd.f32 %v604_v63, %v478_v44  ;;  %v2474_v55 = vpop.f32.mrb[5].mxu0  ;;  %v1538_v44 = vor.u32 %v1537_v16, %v1536_v13 }
 0x105   : > { %v481_v21 = vpop.f32.mrb[6].mxu0  ;;  %v612_v50 = vpop.f32.mrb[8].mxu1  ;;  %v1545_v8 = vshrl.u32 %v3697_v54, 16  ;;  %v1548_v52 = vshll.u32 %v3697_v54, 16 }
 0x106   : > { %v3646_v22 = vadd.f32 %v607_v11, %v481_v21  ;;  %v2475_v15 = vpop.f32.mrb[7].mxu0  ;;  %v2516_v24 = vpop.f32.mrb[9].mxu1  ;;  %v1535_v11 = vsel %vm1512_vm7, %v1530_v26, %v1534_v49 }
 0x107   : > { %v615_v25 = vpop.f32.mrb[10].mxu1  ;;  %v1547_v51 = vrot.slane %v1545_v8, 2  ;;  %v1550_v29 = vrot.slane %v1548_v52, 3 }
 0x108   : > { %2701 = vmatmul.mubr.msk.bf16.gmra.mrb[112].mxu0 %vm404_vm2, %v3514_v19  ;;  %v2517_v34 = vpop.f32.mrb[11].mxu1 }
 0x109   : > { %2704 = vmatprep.mubr.msk.bf16.mxu0 %vm3058_vm1, %v3057_v2 }
 0x10a   : > { %2743 = vmatmul.mubr.msk.bf16.gmra.mrb[116].mxu1 %vm404_vm2, %v1527_v30  ;;  %v1540_v30 = vrot.slane %v1021_v7, 2 }
 0x10b   : > { %v486_v37 = vpop.f32.mrb[8].mxu0  ;;  %2746 = vmatprep.mubr.msk.bf16.mxu1 %vm3058_vm1, %v3057_v2 }
 0x10c   : > { %v3658_v18 = vadd.f32 %v612_v50, %v486_v37  ;;  %v2478_v40 = vpop.f32.mrb[9].mxu0  ;;  %v1542_v7 = vor.u32 %v1541_v33, %v1540_v30 }
 0x10d   : > { %v489_v61 = vpop.f32.mrb[10].mxu0  ;;  %v620_v39 = vpop.f32.mrb[12].mxu1 }
 0x10e   : > { %v3660_v56 = vadd.f32 %v615_v25, %v489_v61  ;;  %v2479_v27 = vpop.f32.mrb[11].mxu0  ;;  %v2520_v19 = vpop.f32.mrb[13].mxu1  ;;  %v1539_v25 = vsel %vm1512_vm7, %v1534_v49, %v1538_v44 }
 0x10f   : > { %v623_v45 = vpop.f32.mrb[14].mxu1 }
 0x110   : > { %2705 = vmatmul.mubr.msk.bf16.gmra.mrb[116].mxu0 %vm404_vm2, %v3528_v28  ;;  %v2521_v57 = vpop.f32.mrb[15].mxu1 }
 0x111   : > { %2708 = vmatprep.mubr.msk.bf16.mxu0 %vm3058_vm1, %v3057_v2  ;;  %v3714_v57 = vld [vmem:[%s3189_s14 + $0x58] ss:$0 sps:$4 sm:$0xff]   ;;  %s2863_s14 = smul.u32 36, %s3043_s22 }
 0x112   : > { %2747 = vmatmul.mubr.msk.bf16.gmra.mrb[120].mxu1 %vm404_vm2, %v1531_v48  ;;  %v1543_v48 = vsel %vm1512_vm7, %v1538_v44, %v1542_v7 }
 0x113   : > { %v494_v38 = vpop.f32.mrb[12].mxu0  ;;  %2750 = vmatprep.mubr.msk.bf16.mxu1 %vm3058_vm1, %v3057_v2  ;;  %s2149_s16 = sadd.s32 %s2863_s14, %s2144_s15  ;;  %s2967_s15 = scalar_lea.vmem %s2966_s12, 4608 }
 0x114   : > { %v3672_v42 = vadd.f32 %v620_v39, %v494_v38  ;;  %v2482_v63 = vpop.f32.mrb[13].mxu0  ;;  %s2356_s17 = sshll.u32 %s2149_s16, 7  ;;  %p2969_p5 = scmp.lt.s32.totalorder %s2967_s15, %s2961_s9 }
 0x115   : > { %v497_v3 = vpop.f32.mrb[14].mxu0  ;;  %v628_v1 = vpop.f32.mrb[16].mxu1  ;;  %v1551_v63 = vor.u32 %v1550_v29, %v1547_v51  ;;  %s4103_s27 = scalar_lea.hbm %s4169_s5, %s2356_s17 }
 0x116   : > { %v3674_v62 = vadd.f32 %v623_v45, %v497_v3  ;;  %v2483_v28 = vpop.f32.mrb[15].mxu0  ;;  %v2524_v6 = vpop.f32.mrb[17].mxu1  ;;  %v1554_v3 = vshrl.u32 %v3714_v57, 16  ;;  %p2970_p6 = por %p2969_p5, %p2968_p4 }
 0x117   : > { %v631_v43 = vpop.f32.mrb[18].mxu1 }
 0x118   : > { %2709 = vmatmul.mubr.msk.bf16.gmra.mrb[120].mxu0 %vm404_vm2, %v3542_v41  ;;  %v2525_v31 = vpop.f32.mrb[19].mxu1  ;;  %v1556_v44 = vrot.slane %v1554_v3, 2  ;;  %v1719_v3 = vrot.slane %v3218_v23, 3  ;;  %v1721_v23 = vrot.slane %v3251_v35, 3  ;;  %p2971_p7 = pnand %p2970_p6, %p2964_p2 }
 0x119   : > { %2712 = vmatprep.mubr.msk.bf16.mxu0 %vm3058_vm1, %v3057_v2 }
 0x11a   : > { %2751 = vmatmul.mubr.msk.bf16.gmra.mrb[124].mxu1 %vm404_vm2, %v1535_v11 }
 0x11b   : > { %v502_v32 = vpop.f32.mrb[16].mxu0  ;;  %2754 = vmatprep.mubr.msk.bf16.mxu1 %vm3058_vm1, %v3057_v2 }
 0x11c   : > { %v3686_v17 = vadd.f32 %v628_v1, %v502_v32  ;;  %v2486_v55 = vpop.f32.mrb[17].mxu0  ;;  %v1557_v1 = vshll.u32 %v3714_v57, 16  ;;  %v1552_v32 = vsel %vm1512_vm7, %v1542_v7, %v1551_v63 }
 0x11d   : > { %v505_v21 = vpop.f32.mrb[18].mxu0  ;;  %v636_v4 = vpop.f32.mrb[20].mxu1 }
 0x11e   : > { %v3689_v50 = vadd.f32 %v631_v43, %v505_v21  ;;  %v2487_v41 = vpop.f32.mrb[19].mxu0  ;;  %v2528_v15 = vpop.f32.mrb[21].mxu1  ;;  %v1559_v55 = vrot.slane %v1557_v1, 3  ;;  %v1374_v21 = vrot.slane %v3697_v54, 2 }
 0x11f   : > { %v639_v24 = vpop.f32.mrb[22].mxu1 }
 0x120   : > { %2713 = vmatmul.mubr.msk.bf16.gmra.mrb[124].mxu0 %vm404_vm2, %v3556_v58  ;;  %v2529_v34 = vpop.f32.mrb[23].mxu1  ;;  %v1560_v41 = vor.u32 %v1559_v55, %v1556_v44 }
 0x121   : > { %2716 = vmatprep.mubr.msk.bf16.mxu0 %vm3058_vm1, %v3057_v2 }
 0x122   : > { %2755 = vmatmul.mubr.msk.bf16.gmra.mrb[128].mxu1 %vm404_vm2, %v1539_v25  ;;  %v1561_v8 = vsel %vm1512_vm7, %v1551_v63, %v1560_v41  ;;  %v1718_v63 = vrot.slane %v3199_v12, 3 }
 0x123   : > { %v510_v37 = vpop.f32.mrb[20].mxu0  ;;  %2758 = vmatprep.mubr.msk.bf16.mxu1 %vm3058_vm1, %v3057_v2 }
 0x124   : > { %v3708_v26 = vadd.f32 %v636_v4, %v510_v37  ;;  %v2490_v40 = vpop.f32.mrb[21].mxu0 }
 0x125   : > { %v513_v58 = vpop.f32.mrb[22].mxu0  ;;  %v644_v61 = vpop.f32.mrb[24].mxu1  ;;  %v1376_v40 = vrot.slane %v3714_v57, 2 }
 0x126   : > { %v3710_v39 = vadd.f32 %v639_v24, %v513_v58  ;;  %v2491_v27 = vpop.f32.mrb[23].mxu0  ;;  %v2532_v19 = vpop.f32.mrb[25].mxu1 }
 0x127   : > { %v647_v45 = vpop.f32.mrb[26].mxu1  ;;  %v1377_v19 = vsel %vm1193_vm5, %v1374_v21, %v1376_v40 }
 0x128   : > { %2717 = vmatmul.mubr.msk.bf16.gmra.mrb[128].mxu0 %vm404_vm2, %v3570_v5  ;;  %v2533_v38 = vpop.f32.mrb[27].mxu1 }
 0x129   : > { %2720 = vmatprep.mubr.msk.bf16.mxu0 %vm3058_vm1, %v3057_v2 }
 0x12a   : > { %2759 = vmatmul.mubr.msk.bf16.gmra.mrb[132].mxu1 %vm404_vm2, %v1543_v48 }
 0x12b   : > { %v518_v49 = vpop.f32.mrb[24].mxu0  ;;  %2762 = vmatprep.mubr.msk.bf16.mxu1 %vm3058_vm1, %v3057_v2 }
 0x12c   : > { %v3725_v28 = vadd.f32 %v644_v61, %v518_v49  ;;  %v2494_v6 = vpop.f32.mrb[25].mxu0 }
 0x12d   : > { %v521_v43 = vpop.f32.mrb[26].mxu0  ;;  %v652_v5 = vpop.f32.mrb[28].mxu1 }
 0x12e   : > { %v3727_v11 = vadd.f32 %v647_v45, %v521_v43  ;;  %v2495_v13 = vpop.f32.mrb[27].mxu0  ;;  %v2536_v16 = vpop.f32.mrb[29].mxu1 }
 0x12f   : > { %v655_v31 = vpop.f32.mrb[30].mxu1  ;;  %v1720_v13 = vsel %vm1717_vm8, %v1718_v63, %v1719_v3 }
 0x130   : > { %2721 = vmatmul.mubr.msk.bf16.gmra.mrb[132].mxu0 %vm404_vm2, %v3591_v14  ;;  %v2537_v9 = vpop.f32.mrb[31].mxu1  ;;  %v1375_v14 = vsel %vm1193_vm5, %v3582_v10, %v1374_v21 }
 0x131   : > { %2724 = vmatprep.mubr.msk.bf16.mxu0 %vm3058_vm1, %v3057_v2 }
 0x132   : > { %2763 = vmatmul.mubr.msk.bf16.gmra.mrb[136].mxu1 %vm404_vm2, %v1552_v32 }
 0x133   : > { %v526_v4 = vpop.f32.mrb[28].mxu0  ;;  %2766 = vmatprep.mubr.msk.bf16.mxu1 %vm3058_vm1, %v3057_v2 }
 0x134   : > { %v3738_v15 = vadd.f32 %v652_v5, %v526_v4  ;;  %v2498_v24 = vpop.f32.mrb[29].mxu0 }
 0x135   : > { %v529_v25 = vpop.f32.mrb[30].mxu0  ;;  %v660_v30 = vpop.f32.mrb[32].mxu1  ;;  %v1722_v24 = vsel %vm1717_vm8, %v1719_v3, %v1721_v23 }
 0x136   : > { %v3742_v33 = vadd.f32 %v655_v31, %v529_v25  ;;  %v2499_v34 = vpop.f32.mrb[31].mxu0  ;;  %v2540_v37 = vpop.f32.mrb[33].mxu1 }
 0x137   : > { %v663_v7 = vpop.f32.mrb[34].mxu1 }
 0x138   : > { %2725 = vmatmul.mubr.msk.bf16.gmra.mrb[136].mxu0 %vm404_vm2, %v1375_v14  ;;  %v2541_v52 = vpop.f32.mrb[35].mxu1 }
 0x139   : > { %2728 = vmatprep.mubr.msk.bf16.mxu0 %vm3058_vm1, %v3057_v2 }
 0x13a   : > { %2767 = vmatmul.mubr.msk.bf16.gmra.mrb[140].mxu1 %vm404_vm2, %v1561_v8 }
 0x13b   : > { %v534_v58 = vpop.f32.mrb[32].mxu0  ;;  %2824 = vmatprep.mubr.msk.bf16.mxu1 %vm3058_vm1, %v3057_v2 }
 0x13c   : > { %v3752_v10 = vadd.f32 %v660_v30, %v534_v58  ;;  %v2502_v61 = vpop.f32.mrb[33].mxu0 }
 0x13d   : > { %v537_v27 = vpop.f32.mrb[34].mxu0  ;;  %v897_v45 = vpop.f32.mrb[36].mxu1 }
 0x13e   : > { %v3755_v48 = vadd.f32 %v663_v7, %v537_v27  ;;  %v2503_v51 = vpop.f32.mrb[35].mxu0  ;;  %v2584_v29 = vpop.f32.mrb[37].mxu1 }
 0x13f   : > { %v900_v38 = vpop.f32.mrb[38].mxu1 }
 0x140   : > { %2729 = vmatmul.mubr.msk.bf16.gmra.mrb[140].mxu0 %vm404_vm2, %v1377_v19  ;;  %v2585_v49 = vpop.f32.mrb[39].mxu1 }
 0x141   : > { %2772 = vmatprep.mubr.msk.bf16.mxu0 %vm3058_vm1, %v3057_v2 }
 0x143   : > { %v753_v1 = vpop.f32.mrb[36].mxu0 }
 0x144   : > { %v824_v6 = vadd.f32 %v753_v1, %v3629_v60  ;;  %v2546_v43 = vpop.f32.mrb[37].mxu0 }
 0x145   : > { %v756_v5 = vpop.f32.mrb[38].mxu0  ;;  %v905_v16 = vpop.f32.mrb[40].mxu1 }
 0x146   : > { %v825_v31 = vadd.f32 %v756_v5, %v3631_v0  ;;  %v3765_v32 = vadd.f32 %v897_v45, %v824_v6  ;;  %v2547_v44 = vpop.f32.mrb[39].mxu0  ;;  %v2588_v55 = vpop.f32.mrb[41].mxu1 }
 0x147   : > { %v908_v9 = vpop.f32.mrb[42].mxu1  ;;  %v2953_v44 = vld [vmem:[%s4167_s3] sm:$0xff]  }
 0x148   : > { %v3767_v21 = vadd.f32 %v900_v38, %v825_v31  ;;  %2773 = vmatmul.mubr.msk.bf16.vlgmr.msra.gmra.mrb[144].mxu0 %vm404_vm2, %v1720_v13  ;;  %v2589_v12 = vpop.f32.mrb[43].mxu1  ;;  %2809 = vmatpush3.bf16.msra.mxu1 %v2953_v44  ;;  %v1733_v44 = vrot.slane %v3697_v54, 3 }
 0x149   : > { %2776 = vmatprep.mubr.msk.bf16.mxu0 %vm3058_vm1, %v3057_v2  ;;  %2810 = vmatprep.subr.bf16.mxu1 %v3057_v2 }
 0x14b   : > { %v761_v60 = vpop.f32.mrb[40].mxu0 }
 0x14c   : > { %v826_v4 = vadd.f32 %v761_v60, %v3644_v20  ;;  %v2550_v41 = vpop.f32.mrb[41].mxu0  ;;  %v1723_v20 = vrot.slane %v3284_v47, 3 }
 0x14d   : > { %v764_v0 = vpop.f32.mrb[42].mxu0  ;;  %v913_v25 = vpop.f32.mrb[44].mxu1 }
 0x14e   : > { %v827_v14 = vadd.f32 %v764_v0, %v3646_v22  ;;  %v3776_v30 = vadd.f32 %v905_v16, %v826_v4  ;;  %v2551_v34 = vpop.f32.mrb[43].mxu0  ;;  %v2592_v37 = vpop.f32.mrb[45].mxu1  ;;  %v1724_v61 = vsel %vm1717_vm8, %v1721_v23, %v1723_v20 }
 0x14f   : > { %v916_v7 = vpop.f32.mrb[46].mxu1 }
 0x150   : > { %v3778_v8 = vadd.f32 %v908_v9, %v827_v14  ;;  %2777 = vmatmul.mubr.msk.bf16.gmra.mrb[148].mxu0 %vm404_vm2, %v1722_v24  ;;  %v2593_v35 = vpop.f32.mrb[47].mxu1 }
 0x151   : > { %2780 = vmatprep.mubr.msk.bf16.mxu0 %vm3058_vm1, %v3057_v2 }
 0x153   : > { %v769_v52 = vpop.f32.mrb[44].mxu0 }
 0x154   : > { %v828_v40 = vadd.f32 %v769_v52, %v3658_v18  ;;  %v2554_v58 = vpop.f32.mrb[45].mxu0  ;;  %v1725_v18 = vrot.slane %v3303_v53, 3 }
 0x155   : > { %v772_v22 = vpop.f32.mrb[46].mxu0  ;;  %v921_v27 = vpop.f32.mrb[48].mxu1 }
 0x156   : > { %v829_v19 = vadd.f32 %v772_v22, %v3660_v56  ;;  %v3787_v45 = vadd.f32 %v913_v25, %v828_v40  ;;  %v2555_v51 = vpop.f32.mrb[47].mxu0  ;;  %v2596_v29 = vpop.f32.mrb[49].mxu1  ;;  %v1726_v6 = vsel %vm1717_vm8, %v1723_v20, %v1725_v18 }
 0x157   : > { %v924_v38 = vpop.f32.mrb[50].mxu1 }
 0x158   : > { %v3789_v49 = vadd.f32 %v916_v7, %v829_v19  ;;  %2781 = vmatmul.mubr.msk.bf16.gmra.mrb[152].mxu0 %vm404_vm2, %v1724_v61  ;;  %v2597_v47 = vpop.f32.mrb[51].mxu1  ;;  %v1729_v7 = vrot.slane %v3254_v36, 3 }
 0x159   : > { %2784 = vmatprep.mubr.msk.bf16.mxu0 %vm3058_vm1, %v3057_v2 }
 0x15b   : > { %v777_v63 = vpop.f32.mrb[48].mxu0 }
 0x15c   : > { %v830_v3 = vadd.f32 %v777_v63, %v3672_v42  ;;  %v2558_v1 = vpop.f32.mrb[49].mxu0 }
 0x15d   : > { %v780_v56 = vpop.f32.mrb[50].mxu0  ;;  %v929_v43 = vpop.f32.mrb[52].mxu1 }
 0x15e   : > { %v831_v5 = vadd.f32 %v780_v56, %v3674_v62  ;;  %v3798_v13 = vadd.f32 %v921_v27, %v830_v3  ;;  %v2559_v16 = vpop.f32.mrb[51].mxu0  ;;  %v2600_v31 = vpop.f32.mrb[53].mxu1  ;;  %v1727_v62 = vrot.slane %v3322_v59, 3 }
 0x15f   : > { %v932_v55 = vpop.f32.mrb[54].mxu1 }
 0x160   : > { %v3803_v53 = vadd.f32 %v924_v38, %v831_v5  ;;  %2785 = vmatmul.mubr.msk.bf16.gmra.mrb[156].mxu0 %vm404_vm2, %v1726_v6  ;;  %v2601_v42 = vpop.f32.mrb[55].mxu1  ;;  %v1728_v4 = vsel %vm1717_vm8, %v1725_v18, %v1727_v62  ;;  %v1730_v40 = vsel %vm1717_vm8, %v1727_v62, %v1729_v7  ;;  %v1731_v38 = vrot.slane %v3436_v46, 3 }
 0x161   : > { %2788 = vmatprep.mubr.msk.bf16.mxu0 %vm3058_vm1, %v3057_v2 }
 0x162   : > { %v1732_v3 = vsel %vm1717_vm8, %v1729_v7, %v1731_v38 }
 0x163   : > { %v785_v9 = vpop.f32.mrb[52].mxu0 }
 0x164   : > { %v832_v12 = vadd.f32 %v785_v9, %v3686_v17  ;;  %v2562_v23 = vpop.f32.mrb[53].mxu0  ;;  %v2954_v17 = vld [vmem:[%s4167_s3 + $0x8] sm:$0xff]   ;;  %v1734_v9 = vsel %vm1717_vm8, %v1731_v38, %v1733_v44 }
 0x165   : > { %v788_v60 = vpop.f32.mrb[54].mxu0  ;;  %v937_v41 = vpop.f32.mrb[56].mxu1  ;;  %2811 = vmatpush3.bf16.msra.mxu1 %v2954_v17 }
 0x166   : > { %v833_v0 = vadd.f32 %v788_v60, %v3689_v50  ;;  %v3813_v24 = vadd.f32 %v929_v43, %v832_v12  ;;  %v2563_v25 = vpop.f32.mrb[55].mxu0  ;;  %v2604_v14 = vpop.f32.mrb[57].mxu1  ;;  %2812 = vmatprep.subr.bf16.mxu1 %v3057_v2 }
 0x167   : > { %v940_v34 = vpop.f32.mrb[58].mxu1  ;;  %v1735_v14 = vrot.slane %v3714_v57, 3 }
 0x168   : > { %v3815_v37 = vadd.f32 %v932_v55, %v833_v0  ;;  %2789 = vmatmul.mubr.msk.bf16.gmra.mrb[160].mxu0 %vm404_vm2, %v1728_v4  ;;  %v2605_v59 = vpop.f32.mrb[59].mxu1 }
 0x169   : > { %2792 = vmatprep.mubr.msk.bf16.mxu0 %vm3058_vm1, %v3057_v2  ;;  %v1736_v7 = vsel %vm1717_vm8, %v1733_v44, %v1735_v14 }
 0x16b   : > { %v793_v50 = vpop.f32.mrb[56].mxu0 }
 0x16c   : > { %v834_v35 = vadd.f32 %v793_v50, %v3708_v26  ;;  %v2566_v20 = vpop.f32.mrb[57].mxu0  ;;  %v2955_v26 = vld [vmem:[%s4167_s3 + $0x10] sm:$0xff]  }
 0x16d   : > { %v796_v52 = vpop.f32.mrb[58].mxu0  ;;  %v945_v58 = vpop.f32.mrb[60].mxu1  ;;  %2813 = vmatpush3.bf16.msra.mxu1 %v2955_v26 }
 0x16e   : > { %v835_v22 = vadd.f32 %v796_v52, %v3710_v39  ;;  %v3828_v61 = vadd.f32 %v937_v41, %v834_v35  ;;  %v2567_v27 = vpop.f32.mrb[59].mxu0  ;;  %v2608_v19 = vpop.f32.mrb[61].mxu1  ;;  %2814 = vmatprep.subr.bf16.mxu1 %v3057_v2 }
 0x16f   : > { %v948_v51 = vpop.f32.mrb[62].mxu1 }
 0x170   : > { %v3830_v29 = vadd.f32 %v940_v34, %v835_v22  ;;  %2793 = vmatmul.mubr.msk.bf16.gmra.mrb[164].mxu0 %vm404_vm2, %v1730_v40  ;;  %v2609_v36 = vpop.f32.mrb[63].mxu1 }
 0x171   : > { %2796 = vmatprep.mubr.msk.bf16.mxu0 %vm3058_vm1, %v3057_v2 }
 0x173   : > { %v801_v39 = vpop.f32.mrb[60].mxu0 }
 0x174   : > { %v836_v47 = vadd.f32 %v801_v39, %v3725_v28  ;;  %v2570_v18 = vpop.f32.mrb[61].mxu0  ;;  %v2956_v28 = vld [vmem:[%s4167_s3 + $0x18] sm:$0xff]  }
 0x175   : > { %v804_v63 = vpop.f32.mrb[62].mxu0  ;;  %v953_v1 = vpop.f32.mrb[64].mxu1  ;;  %2815 = vmatpush3.bf16.msra.mxu1 %v2956_v28 }
 0x176   : > { %v837_v56 = vadd.f32 %v804_v63, %v3727_v11  ;;  %v3843_v6 = vadd.f32 %v945_v58, %v836_v47  ;;  %v2571_v43 = vpop.f32.mrb[63].mxu0  ;;  %v2612_v5 = vpop.f32.mrb[65].mxu1  ;;  %2816 = vmatprep.subr.bf16.mxu1 %v3057_v2 }
 0x177   : > { %v956_v16 = vpop.f32.mrb[66].mxu1  ;;  %v2959_v43 = vld [vmem:[%s4167_s3 + $0x30] sm:$0xff]  }
 0x178   : > { %v3845_v31 = vadd.f32 %v948_v51, %v837_v56  ;;  %2797 = vmatmul.mubr.msk.bf16.gmra.mrb[168].mxu0 %vm404_vm2, %v1732_v3  ;;  %v2613_v46 = vpop.f32.mrb[67].mxu1  ;;  %v2958_v51 = vld [vmem:[%s4167_s3 + $0x28] sm:$0xff]  }
 0x179   : > { %2800 = vmatprep.mubr.msk.bf16.mxu0 %vm3058_vm1, %v3057_v2 }
 0x17b   : > { %v809_v11 = vpop.f32.mrb[64].mxu0 }
 0x17c   : > { %v838_v55 = vadd.f32 %v809_v11, %v3738_v15  ;;  %v2574_v42 = vpop.f32.mrb[65].mxu0  ;;  %v2957_v15 = vld [vmem:[%s4167_s3 + $0x20] sm:$0xff]  }
 0x17d   : > { %v812_v62 = vpop.f32.mrb[66].mxu0  ;;  %v961_v12 = vpop.f32.mrb[68].mxu1  ;;  %2817 = vmatpush3.bf16.msra.mxu1 %v2957_v15 }
 0x17e   : > { %v839_v23 = vadd.f32 %v812_v62, %v3742_v33  ;;  %v3858_v60 = vadd.f32 %v953_v1, %v838_v55  ;;  %v2575_v4 = vpop.f32.mrb[67].mxu0  ;;  %v2616_v41 = vpop.f32.mrb[69].mxu1  ;;  %2818 = vmatprep.subr.bf16.mxu1 %v3057_v2 }
 0x17f   : > { %v964_v0 = vpop.f32.mrb[70].mxu1 }
 0x180   : > { %v3860_v25 = vadd.f32 %v956_v16, %v839_v23  ;;  %2801 = vmatmul.mubr.msk.bf16.gmra.mrb[172].mxu0 %vm404_vm2, %v1734_v9  ;;  %v2617_v54 = vpop.f32.mrb[71].mxu1 }
 0x181   : > { %2804 = vmatprep.mubr.msk.bf16.mxu0 %vm3058_vm1, %v3057_v2  ;;  %2819 = vmatpush3.bf16.msra.mxu1 %v2958_v51 }
 0x182   : > { %2820 = vmatprep.subr.bf16.mxu1 %v3057_v2 }
 0x183   : > { %v817_v33 = vpop.f32.mrb[68].mxu0 }
 0x184   : > { %v840_v34 = vadd.f32 %v817_v33, %v3752_v10  ;;  %v2578_v59 = vpop.f32.mrb[69].mxu0  ;;  %v2960_v33 = vld [vmem:[%s4167_s3 + $0x38] sm:$0xff]  }
 0x185   : > { %v820_v17 = vpop.f32.mrb[70].mxu0  ;;  %v1277_v50 = vpop.f32.mrb[72].mxu1  ;;  %2821 = vmatpush3.bf16.msra.mxu1 %v2959_v43 }
 0x186   : > { %v841_v35 = vadd.f32 %v820_v17, %v3755_v48  ;;  %v3873_v20 = vadd.f32 %v961_v12, %v840_v34  ;;  %v2579_v52 = vpop.f32.mrb[71].mxu0  ;;  %v2660_v40 = vpop.f32.mrb[73].mxu1  ;;  %2822 = vmatprep.subr.bf16.mxu1 %v3057_v2 }
 0x187   : > { %v1280_v58 = vpop.f32.mrb[74].mxu1 }
 0x188   : > { %v3875_v22 = vadd.f32 %v964_v0, %v841_v35  ;;  %2805 = vmatmul.mubr.msk.bf16.gmra.mrb[176].mxu0 %vm404_vm2, %v1736_v7  ;;  %v2661_v57 = vpop.f32.mrb[75].mxu1 }
 0x189   : > { %2823 = vmatpush3.bf16.msra.mxu1 %v2960_v33 }
 0x18b   : > { %v1102_v27 = vpop.f32.mrb[72].mxu0 }
 0x18c   : > { %v1173_v10 = vadd.f32 %v1102_v27, %v3765_v32  ;;  %v2622_v19 = vpop.f32.mrb[73].mxu0 }
 0x18d   : > { %v1105_v36 = vpop.f32.mrb[74].mxu0  ;;  %v1285_v48 = vpop.f32.mrb[76].mxu1 }
 0x18e   : > { %v1174_v26 = vadd.f32 %v1105_v36, %v3767_v21  ;;  %v3883_v38 = vadd.f32 %v1277_v50, %v1173_v10  ;;  %v2623_v39 = vpop.f32.mrb[75].mxu0  ;;  %v2664_v47 = vpop.f32.mrb[77].mxu1 }
 0x18f   : > { %v1288_v18 = vpop.f32.mrb[78].mxu1 }
 0x190   : > { %v3886_v63 = vadd.f32 %v1280_v58, %v1174_v26  ;;  %v2665_v32 = vpop.f32.mrb[79].mxu1 }
 0x193   : > { %v1110_v3 = vpop.f32.mrb[76].mxu0 }
 0x194   : > { %v1175_v1 = vadd.f32 %v1110_v3, %v3776_v30  ;;  %v2626_v56 = vpop.f32.mrb[77].mxu0 }
 0x195   : > { %v1113_v21 = vpop.f32.mrb[78].mxu0  ;;  %v1293_v5 = vpop.f32.mrb[80].mxu1 }
 0x196   : > { %v1176_v16 = vadd.f32 %v1113_v21, %v3778_v8  ;;  %v3893_v46 = vadd.f32 %v1285_v48, %v1175_v1  ;;  %v2627_v28 = vpop.f32.mrb[79].mxu0  ;;  %v2668_v44 = vpop.f32.mrb[81].mxu1 }
 0x197   : > { %v1296_v11 = vpop.f32.mrb[82].mxu1 }
 0x198   : > { %v3896_v55 = vadd.f32 %v1288_v18, %v1176_v16  ;;  %v2669_v30 = vpop.f32.mrb[83].mxu1 }
 0x19b   : > { %v1118_v42 = vpop.f32.mrb[80].mxu0 }
 0x19c   : > { %v1177_v62 = vadd.f32 %v1118_v42, %v3787_v45  ;;  %v2630_v9 = vpop.f32.mrb[81].mxu0 }
 0x19d   : > { %v1121_v12 = vpop.f32.mrb[82].mxu0  ;;  %v1301_v23 = vpop.f32.mrb[84].mxu1 }
 0x19e   : > { %v1178_v4 = vadd.f32 %v1121_v12, %v3789_v49  ;;  %v3900_v8 = vadd.f32 %v1293_v5, %v1177_v62  ;;  %v2631_v41 = vpop.f32.mrb[83].mxu0  ;;  %v2672_v0 = vpop.f32.mrb[85].mxu1 }
 0x19f   : > { %v1304_v54 = vpop.f32.mrb[86].mxu1 }
 0x1a0   : > { %v3902_v15 = vadd.f32 %v1296_v11, %v1178_v4  ;;  %v2673_v14 = vpop.f32.mrb[87].mxu1 }
 0x1a3   : > { %v1126_v34 = vpop.f32.mrb[84].mxu0 }
 0x1a4   : > { %v1179_v45 = vadd.f32 %v1126_v34, %v3798_v13  ;;  %v2634_v59 = vpop.f32.mrb[85].mxu0 }
 0x1a5   : > { %v1129_v17 = vpop.f32.mrb[86].mxu0  ;;  %v1309_v7 = vpop.f32.mrb[88].mxu1 }
 0x1a6   : > { %v1180_v49 = vadd.f32 %v1129_v17, %v3803_v53  ;;  %v3909_v50 = vadd.f32 %v1301_v23, %v1179_v45  ;;  %v2635_v35 = vpop.f32.mrb[87].mxu0  ;;  %v2676_v52 = vpop.f32.mrb[89].mxu1 }
 0x1a7   : > { %v1312_v40 = vpop.f32.mrb[90].mxu1 }
 0x1a8   : > { %v3911_v58 = vadd.f32 %v1304_v54, %v1180_v49  ;;  %v2677_v57 = vpop.f32.mrb[91].mxu1 }
 0x1ab   : > { %v1134_v27 = vpop.f32.mrb[88].mxu0 }
 0x1ac   : > { %v1181_v10 = vadd.f32 %v1134_v27, %v3813_v24  ;;  %v2638_v19 = vpop.f32.mrb[89].mxu0 }
 0x1ad   : > { %v1137_v51 = vpop.f32.mrb[90].mxu0  ;;  %v1317_v36 = vpop.f32.mrb[92].mxu1 }
 0x1ae   : > { %v1182_v13 = vadd.f32 %v1137_v51, %v3815_v37  ;;  %v3915_v48 = vadd.f32 %v1309_v7, %v1181_v10  ;;  %v2639_v26 = vpop.f32.mrb[91].mxu0  ;;  %v2680_v53 = vpop.f32.mrb[93].mxu1 }
 0x1af   : > { %v1320_v39 = vpop.f32.mrb[94].mxu1 }
 0x1b0   : > { %v3917_v47 = vadd.f32 %v1312_v40, %v1182_v13  ;;  %v2681_v18 = vpop.f32.mrb[95].mxu1 }
 0x1b3   : > { %v1142_v32 = vpop.f32.mrb[92].mxu0 }
 0x1b4   : > { %v1183_v3 = vadd.f32 %v1142_v32, %v3828_v61  ;;  %v2642_v1 = vpop.f32.mrb[93].mxu0 }
 0x1b5   : > { %v1145_v56 = vpop.f32.mrb[94].mxu0  ;;  %v1325_v43 = vpop.f32.mrb[96].mxu1 }
 0x1b6   : > { %v1184_v24 = vadd.f32 %v1145_v56, %v3830_v29  ;;  %v3921_v21 = vadd.f32 %v1317_v36, %v1183_v3  ;;  %v2643_v5 = vpop.f32.mrb[95].mxu0  ;;  %v2684_v37 = vpop.f32.mrb[97].mxu1 }
 0x1b7   : > { %v1328_v16 = vpop.f32.mrb[98].mxu1 }
 0x1b8   : > { %v3923_v28 = vadd.f32 %v1320_v39, %v1184_v24  ;;  %v2685_v44 = vpop.f32.mrb[99].mxu1 }
 0x1bb   : > { %v1150_v11 = vpop.f32.mrb[96].mxu0 }
 0x1bc   : > { %v1185_v30 = vadd.f32 %v1150_v11, %v3843_v6  ;;  %v2646_v42 = vpop.f32.mrb[97].mxu0 }
 0x1bd   : > { %v1153_v62 = vpop.f32.mrb[98].mxu0  ;;  %v1333_v9 = vpop.f32.mrb[100].mxu1 }
 0x1be   : > { %v1186_v61 = vadd.f32 %v1153_v62, %v3845_v31  ;;  %v3927_v12 = vadd.f32 %v1325_v43, %v1185_v30  ;;  %v2647_v23 = vpop.f32.mrb[99].mxu0  ;;  %v2688_v29 = vpop.f32.mrb[101].mxu1 }
 0x1bf   : > { %v1336_v4 = vpop.f32.mrb[102].mxu1 }
 0x1c0   : > { %v3929_v41 = vadd.f32 %v1328_v16, %v1186_v61  ;;  %v2689_v0 = vpop.f32.mrb[103].mxu1 }
 0x1c3   : > { %v1158_v54 = vpop.f32.mrb[100].mxu0 }
 0x1c4   : > { %v1187_v14 = vadd.f32 %v1158_v54, %v3858_v60  ;;  %v2650_v33 = vpop.f32.mrb[101].mxu0 }
 0x1c5   : > { %v1161_v34 = vpop.f32.mrb[102].mxu0  ;;  %v1341_v45 = vpop.f32.mrb[104].mxu1 }
 0x1c6   : > { %v1188_v6 = vadd.f32 %v1161_v34, %v3860_v25  ;;  %v3933_v59 = vadd.f32 %v1333_v9, %v1187_v14  ;;  %v2651_v17 = vpop.f32.mrb[103].mxu0  ;;  %v2692_v31 = vpop.f32.mrb[105].mxu1 }
 0x1c7   : > { %v1344_v7 = vpop.f32.mrb[106].mxu1 }
 0x1c8   : > { %v3935_v49 = vadd.f32 %v1336_v4, %v1188_v6  ;;  %v2693_v35 = vpop.f32.mrb[107].mxu1 }
 0x1cb   : > { %v1166_v52 = vpop.f32.mrb[104].mxu0 }
 0x1cc   : > { %v1189_v40 = vadd.f32 %v1166_v52, %v3873_v20  ;;  %v2654_v57 = vpop.f32.mrb[105].mxu0 }
 0x1cd   : > { %v1169_v27 = vpop.f32.mrb[106].mxu0  ;;  %v1626_v10 = vpop.f32.mrb[108].mxu1 }
 0x1ce   : > { %v1190_v60 = vadd.f32 %v1169_v27, %v3875_v22  ;;  %v3939_v19 = vadd.f32 %v1341_v45, %v1189_v40  ;;  %v2655_v51 = vpop.f32.mrb[107].mxu0  ;;  %v2736_v25 = vpop.f32.mrb[109].mxu1 }
 0x1cf   : > { %v1629_v36 = vpop.f32.mrb[110].mxu1 }
 0x1d0   : > { %v3941_v13 = vadd.f32 %v1344_v7, %v1190_v60  ;;  %v2737_v26 = vpop.f32.mrb[111].mxu1 }
 0x1d3   : > { %v1421_v53 = vpop.f32.mrb[108].mxu0 }
 0x1d4   : > { %v1492_v39 = vadd.f32 %v1421_v53, %v3883_v38  ;;  %v2698_v18 = vpop.f32.mrb[109].mxu0 }
 0x1d5   : > { %v1424_v32 = vpop.f32.mrb[110].mxu0  ;;  %v1634_v3 = vpop.f32.mrb[112].mxu1 }
 0x1d6   : > { %v1493_v20 = vadd.f32 %v1424_v32, %v3886_v63  ;;  %v3945_v1 = vadd.f32 %v1626_v10, %v1492_v39  ;;  %v2699_v56 = vpop.f32.mrb[111].mxu0  ;;  %v2740_v22 = vpop.f32.mrb[113].mxu1 }
 0x1d7   : > { %v1637_v43 = vpop.f32.mrb[114].mxu1 }
 0x1d8   : > { %v3947_v24 = vadd.f32 %v1629_v36, %v1493_v20  ;;  %v2741_v5 = vpop.f32.mrb[115].mxu1 }
 0x1db   : > { %v1429_v37 = vpop.f32.mrb[112].mxu0 }
 0x1dc   : > { %v1494_v16 = vadd.f32 %v1429_v37, %v3893_v46  ;;  %v2702_v44 = vpop.f32.mrb[113].mxu0 }
 0x1dd   : > { %v1432_v11 = vpop.f32.mrb[114].mxu0  ;;  %v1642_v30 = vpop.f32.mrb[116].mxu1 }
 0x1de   : > { %v1495_v38 = vadd.f32 %v1432_v11, %v3896_v55  ;;  %v3951_v42 = vadd.f32 %v1634_v3, %v1494_v16  ;;  %v2703_v62 = vpop.f32.mrb[115].mxu0  ;;  %v2744_v63 = vpop.f32.mrb[117].mxu1 }
 0x1df   : > { %v1645_v9 = vpop.f32.mrb[118].mxu1 }
 0x1e0   : > { %v3953_v61 = vadd.f32 %v1637_v43, %v1495_v38  ;;  %v2745_v23 = vpop.f32.mrb[119].mxu1 }
 0x1e3   : > { %v1437_v29 = vpop.f32.mrb[116].mxu0 }
 0x1e4   : > { %v1496_v4 = vadd.f32 %v1437_v29, %v3900_v8  ;;  %v2706_v0 = vpop.f32.mrb[117].mxu0 }
 0x1e5   : > { %v1440_v54 = vpop.f32.mrb[118].mxu0  ;;  %v1650_v14 = vpop.f32.mrb[120].mxu1 }
 0x1e6   : > { %v1497_v46 = vadd.f32 %v1440_v54, %v3902_v15  ;;  %v3957_v33 = vadd.f32 %v1642_v30, %v1496_v4  ;;  %v2707_v34 = vpop.f32.mrb[119].mxu0  ;;  %v2748_v55 = vpop.f32.mrb[121].mxu1 }
 0x1e7   : > { %v1653_v45 = vpop.f32.mrb[122].mxu1 }
 0x1e8   : > { %v3959_v6 = vadd.f32 %v1645_v9, %v1497_v46  ;;  %v2749_v17 = vpop.f32.mrb[123].mxu1 }
 0x1eb   : > { %v1445_v31 = vpop.f32.mrb[120].mxu0 }
 0x1ec   : > { %v1498_v7 = vadd.f32 %v1445_v31, %v3909_v50  ;;  %v2710_v35 = vpop.f32.mrb[121].mxu0 }
 0x1ed   : > { %v1448_v52 = vpop.f32.mrb[122].mxu0  ;;  %v1658_v40 = vpop.f32.mrb[124].mxu1 }
 0x1ee   : > { %v1499_v8 = vadd.f32 %v1448_v52, %v3911_v58  ;;  %v3963_v57 = vadd.f32 %v1650_v14, %v1498_v7  ;;  %v2711_v27 = vpop.f32.mrb[123].mxu0  ;;  %v2752_v15 = vpop.f32.mrb[125].mxu1 }
 0x1ef   : > { %v1661_v10 = vpop.f32.mrb[126].mxu1 }
 0x1f0   : > { %v3965_v60 = vadd.f32 %v1653_v45, %v1499_v8  ;;  %v2753_v51 = vpop.f32.mrb[127].mxu1 }
 0x1f3   : > { %v1453_v25 = vpop.f32.mrb[124].mxu0 }
 0x1f4   : > { %v1500_v36 = vadd.f32 %v1453_v25, %v3915_v48  ;;  %v2714_v26 = vpop.f32.mrb[125].mxu0 }
 0x1f5   : > { %v1456_v53 = vpop.f32.mrb[126].mxu0  ;;  %v1666_v39 = vpop.f32.mrb[128].mxu1 }
 0x1f6   : > { %v1501_v50 = vadd.f32 %v1456_v53, %v3917_v47  ;;  %v3969_v18 = vadd.f32 %v1658_v40, %v1500_v36  ;;  %v2715_v32 = vpop.f32.mrb[127].mxu0  ;;  %v2756_v58 = vpop.f32.mrb[129].mxu1 }
 0x1f7   : > { %v1669_v3 = vpop.f32.mrb[130].mxu1 }
 0x1f8   : > { %v3971_v20 = vadd.f32 %v1661_v10, %v1501_v50  ;;  %v2757_v56 = vpop.f32.mrb[131].mxu1 }
 0x1fb   : > { %v1461_v22 = vpop.f32.mrb[128].mxu0 }
 0x1fc   : > { %v1502_v43 = vadd.f32 %v1461_v22, %v3921_v21  ;;  %v2718_v5 = vpop.f32.mrb[129].mxu0 }
 0x1fd   : > { %v1464_v37 = vpop.f32.mrb[130].mxu0  ;;  %v1674_v16 = vpop.f32.mrb[132].mxu1 }
 0x1fe   : > { %v1503_v48 = vadd.f32 %v1464_v37, %v3923_v28  ;;  %v3975_v44 = vadd.f32 %v1666_v39, %v1502_v43  ;;  %v2719_v11 = vpop.f32.mrb[131].mxu0  ;;  %v2760_v47 = vpop.f32.mrb[133].mxu1  ;;  %v4000_v39 = vld [vmem:[%s4166_s2] ss:$0 sm:$0xff] }
 0x1ff   : > { %v1677_v30 = vpop.f32.mrb[134].mxu1 }
 0x200   : > { %v3977_v38 = vadd.f32 %v1669_v3, %v1503_v48  ;;  %v2761_v62 = vpop.f32.mrb[135].mxu1 }
 0x203   : > { %v1469_v63 = vpop.f32.mrb[132].mxu0 }
 0x204   : > { %v1504_v9 = vadd.f32 %v1469_v63, %v3927_v12  ;;  %v2722_v23 = vpop.f32.mrb[133].mxu0 }
 0x205   : > { %v1472_v29 = vpop.f32.mrb[134].mxu0  ;;  %v1682_v4 = vpop.f32.mrb[136].mxu1 }
 0x206   : > { %v1505_v21 = vadd.f32 %v1472_v29, %v3929_v41  ;;  %v3981_v0 = vadd.f32 %v1674_v16, %v1504_v9  ;;  %v2723_v54 = vpop.f32.mrb[135].mxu0  ;;  %v2764_v28 = vpop.f32.mrb[137].mxu1 }
 0x207   : > { %v1685_v14 = vpop.f32.mrb[138].mxu1 }
 0x208   : > { %v3983_v46 = vadd.f32 %v1677_v30, %v1505_v21  ;;  %v2765_v34 = vpop.f32.mrb[139].mxu1 }
 0x20b   : > { %v1477_v55 = vpop.f32.mrb[136].mxu0 }
 0x20c   : > { %v1506_v45 = vadd.f32 %v1477_v55, %v3933_v59  ;;  %v2726_v17 = vpop.f32.mrb[137].mxu0 }
 0x20d   : > { %v1480_v31 = vpop.f32.mrb[138].mxu0  ;;  %v1690_v7 = vpop.f32.mrb[140].mxu1 }
 0x20e   : > { %v1507_v12 = vadd.f32 %v1480_v31, %v3935_v49  ;;  %v3987_v35 = vadd.f32 %v1682_v4, %v1506_v45  ;;  %v2727_v52 = vpop.f32.mrb[139].mxu0  ;;  %v2768_v41 = vpop.f32.mrb[141].mxu1 }
 0x20f   : > { %v1693_v40 = vpop.f32.mrb[142].mxu1 }
 0x210   : > { %v3989_v8 = vadd.f32 %v1685_v14, %v1507_v12  ;;  %v2769_v27 = vpop.f32.mrb[143].mxu1 }
 0x213   : > { %v1485_v15 = vpop.f32.mrb[140].mxu0 }
 0x214   : > { %v1508_v10 = vadd.f32 %v1485_v15, %v3939_v19  ;;  %v2730_v51 = vpop.f32.mrb[141].mxu0 }
 0x215   : > { %v1488_v25 = vpop.f32.mrb[142].mxu0 }
 0x216   : > { %v1509_v59 = vadd.f32 %v1488_v25, %v3941_v13  ;;  %v3993_v36 = vadd.f32 %v1690_v7, %v1508_v10  ;;  %v2731_v26 = vpop.f32.mrb[143].mxu0 }
 0x218   : > { %v3995_v53 = vadd.f32 %v1693_v40, %v1509_v59 }
 0x21b   : > { %v1801_v49 = vpop.f32.mrb[144].mxu0 }
 0x21c   : > { %v1872_v50 = vadd.f32 %v1801_v49, %v3945_v1  ;;  %v2774_v32 = vpop.f32.mrb[145].mxu0 }
 0x21d   : > { %v1804_v58 = vpop.f32.mrb[146].mxu0 }
 0x21e   : > { %v1897_v19 = vadd.f32 %v4000_v39, %v1872_v50  ;;  %v1873_v3 = vadd.f32 %v1804_v58, %v3947_v24  ;;  %v2775_v13 = vpop.f32.mrb[147].mxu0 }
 0x220   : > { %v1898_v56 = vadd.f32 %v4000_v39, %v1873_v3  ;;  %v1915_v22 = vmax.f32 %v1897_v19, 0.0 }
 0x222   : > { %v1916_v43 = vmax.f32 %v1898_v56, 0.0 }
 0x223   : > { %v1809_v5 = vpop.f32.mrb[148].mxu0 }
 0x224   : > { %v1933_v37 = vpack.c.bf16 %v1916_v43, %v1915_v22  ;;  %v1874_v16 = vadd.f32 %v1809_v5, %v3951_v42  ;;  %v2778_v48 = vpop.f32.mrb[149].mxu0 }
 0x225   : > { %v1812_v11 = vpop.f32.mrb[150].mxu0 }
 0x226   : > { %v1899_v47 = vadd.f32 %v4000_v39, %v1874_v16  ;;  %v1875_v1 = vadd.f32 %v1812_v11, %v3953_v61  ;;  %v2779_v30 = vpop.f32.mrb[151].mxu0  ;;  %2825 = vmatmul.mubr.bf16.vlgmr.msra.gmra.mrb[144].mxu1 %v1933_v37 }
 0x227   : > { %2828 = vmatprep.mubr.msk.bf16.mxu1 %vm3058_vm1, %v3057_v2 }
 0x228   : > { %v1900_v24 = vadd.f32 %v4000_v39, %v1875_v1  ;;  %v1917_v62 = vmax.f32 %v1899_v47, 0.0 }
 0x22a   : > { %v1918_v63 = vmax.f32 %v1900_v24, 0.0 }
 0x22b   : > { %v1817_v9 = vpop.f32.mrb[152].mxu0 }
 0x22c   : > { %v1876_v23 = vadd.f32 %v1817_v9, %v3957_v33  ;;  %v2782_v29 = vpop.f32.mrb[153].mxu0  ;;  %v1934_v42 = vpack.c.bf16 %v1918_v63, %v1917_v62 }
 0x22d   : > { %v1820_v4 = vpop.f32.mrb[154].mxu0 }
 0x22e   : > { %v1901_v21 = vadd.f32 %v4000_v39, %v1876_v23  ;;  %v1877_v54 = vadd.f32 %v1820_v4, %v3959_v6  ;;  %v2783_v61 = vpop.f32.mrb[155].mxu0  ;;  %2829 = vmatmul.mubr.bf16.gmra.mrb[148].mxu1 %v1934_v42 }
 0x22f   : > { %2832 = vmatprep.mubr.msk.bf16.mxu1 %vm3058_vm1, %v3057_v2 }
 0x230   : > { %v1902_v28 = vadd.f32 %v4000_v39, %v1877_v54  ;;  %v1919_v14 = vmax.f32 %v1901_v21, 0.0 }
 0x232   : > { %v1920_v34 = vmax.f32 %v1902_v28, 0.0 }
 0x233   : > { %v1825_v55 = vpop.f32.mrb[156].mxu0 }
 0x234   : > { %v1878_v45 = vadd.f32 %v1825_v55, %v3963_v57  ;;  %v2786_v33 = vpop.f32.mrb[157].mxu0  ;;  %v1935_v17 = vpack.c.bf16 %v1920_v34, %v1919_v14 }
 0x235   : > { %v1828_v31 = vpop.f32.mrb[158].mxu0 }
 0x236   : > { %v1903_v7 = vadd.f32 %v4000_v39, %v1878_v45  ;;  %v1879_v12 = vadd.f32 %v1828_v31, %v3965_v60  ;;  %v2787_v6 = vpop.f32.mrb[159].mxu0  ;;  %2833 = vmatmul.mubr.bf16.gmra.mrb[152].mxu1 %v1935_v17 }
 0x237   : > { %2836 = vmatprep.mubr.msk.bf16.mxu1 %vm3058_vm1, %v3057_v2 }
 0x238   : > { %v1904_v52 = vadd.f32 %v4000_v39, %v1879_v12  ;;  %v1921_v41 = vmax.f32 %v1903_v7, 0.0 }
 0x23a   : > { %v1922_v40 = vmax.f32 %v1904_v52, 0.0 }
 0x23b   : > { %v1833_v27 = vpop.f32.mrb[160].mxu0 }
 0x23c   : > { %v1880_v15 = vadd.f32 %v1833_v27, %v3969_v18  ;;  %v2790_v57 = vpop.f32.mrb[161].mxu0  ;;  %v1936_v10 = vpack.c.bf16 %v1922_v40, %v1921_v41 }
 0x23d   : > { %v1836_v51 = vpop.f32.mrb[162].mxu0 }
 0x23e   : > { %v1905_v25 = vadd.f32 %v4000_v39, %v1880_v15  ;;  %v1881_v59 = vadd.f32 %v1836_v51, %v3971_v20  ;;  %v2791_v60 = vpop.f32.mrb[163].mxu0  ;;  %2837 = vmatmul.mubr.bf16.gmra.mrb[156].mxu1 %v1936_v10 }
 0x23f   : > { %2840 = vmatprep.mubr.msk.bf16.mxu1 %vm3058_vm1, %v3057_v2 }
 0x240   : > { %v1906_v26 = vadd.f32 %v4000_v39, %v1881_v59  ;;  %v1923_v49 = vmax.f32 %v1905_v25, 0.0 }
 0x242   : > { %v1924_v50 = vmax.f32 %v1906_v26, 0.0 }
 0x243   : > { %v1841_v32 = vpop.f32.mrb[164].mxu0 }
 0x244   : > { %v1882_v58 = vadd.f32 %v1841_v32, %v3975_v44  ;;  %v2794_v18 = vpop.f32.mrb[165].mxu0  ;;  %v1937_v19 = vpack.c.bf16 %v1924_v50, %v1923_v49 }
 0x245   : > { %v1844_v3 = vpop.f32.mrb[166].mxu0 }
 0x246   : > { %v1907_v13 = vadd.f32 %v4000_v39, %v1882_v58  ;;  %v1883_v56 = vadd.f32 %v1844_v3, %v3977_v38  ;;  %v2795_v20 = vpop.f32.mrb[167].mxu0  ;;  %2841 = vmatmul.mubr.bf16.gmra.mrb[160].mxu1 %v1937_v19 }
 0x247   : > { %2844 = vmatprep.mubr.msk.bf16.mxu1 %vm3058_vm1, %v3057_v2 }
 0x248   : > { %v1908_v22 = vadd.f32 %v4000_v39, %v1883_v56  ;;  %v1925_v43 = vmax.f32 %v1907_v13, 0.0 }
 0x24a   : > { %v1926_v5 = vmax.f32 %v1908_v22, 0.0 }
 0x24b   : > { %v1849_v37 = vpop.f32.mrb[168].mxu0 }
 0x24c   : > { %v1884_v16 = vadd.f32 %v1849_v37, %v3981_v0  ;;  %v2798_v44 = vpop.f32.mrb[169].mxu0  ;;  %v1938_v48 = vpack.c.bf16 %v1926_v5, %v1925_v43 }
 0x24d   : > { %v1852_v11 = vpop.f32.mrb[170].mxu0 }
 0x24e   : > { %v1909_v47 = vadd.f32 %v4000_v39, %v1884_v16  ;;  %v1885_v1 = vadd.f32 %v1852_v11, %v3983_v46  ;;  %v2799_v38 = vpop.f32.mrb[171].mxu0  ;;  %2845 = vmatmul.mubr.bf16.gmra.mrb[164].mxu1 %v1938_v48 }
 0x24f   : > { %2848 = vmatprep.mubr.msk.bf16.mxu1 %vm3058_vm1, %v3057_v2 }
 0x250   : > { %v1910_v30 = vadd.f32 %v4000_v39, %v1885_v1  ;;  %v1927_v24 = vmax.f32 %v1909_v47, 0.0 }
 0x252   : > { %v1928_v62 = vmax.f32 %v1910_v30, 0.0 }
 0x253   : > { %v1857_v63 = vpop.f32.mrb[172].mxu0 }
 0x254   : > { %v1886_v9 = vadd.f32 %v1857_v63, %v3987_v35  ;;  %v2802_v0 = vpop.f32.mrb[173].mxu0  ;;  %v1939_v23 = vpack.c.bf16 %v1928_v62, %v1927_v24 }
 0x255   : > { %v1860_v29 = vpop.f32.mrb[174].mxu0 }
 0x256   : > { %v1911_v42 = vadd.f32 %v4000_v39, %v1886_v9  ;;  %v1887_v4 = vadd.f32 %v1860_v29, %v3989_v8  ;;  %v2803_v46 = vpop.f32.mrb[175].mxu0  ;;  %2849 = vmatmul.mubr.bf16.gmra.mrb[168].mxu1 %v1939_v23 }
 0x257   : > { %2852 = vmatprep.mubr.msk.bf16.mxu1 %vm3058_vm1, %v3057_v2 }
 0x258   : > { %v1912_v21 = vadd.f32 %v4000_v39, %v1887_v4  ;;  %v1929_v54 = vmax.f32 %v1911_v42, 0.0 }
 0x25a   : > { %v1930_v61 = vmax.f32 %v1912_v21, 0.0 }
 0x25b   : > { %v1865_v28 = vpop.f32.mrb[176].mxu0 }
 0x25c   : > { %v1888_v35 = vadd.f32 %v1865_v28, %v3993_v36  ;;  %v2806_v14 = vpop.f32.mrb[177].mxu0  ;;  %v1940_v34 = vpack.c.bf16 %v1930_v61, %v1929_v54  ;;  %v4060_v36 = vld [vmem:[%s4168_s4] ss:$0 sm:$0xff] }
 0x25d   : > { %v1868_v55 = vpop.f32.mrb[178].mxu0 }
 0x25e   : > { %v1913_v45 = vadd.f32 %v4000_v39, %v1888_v35  ;;  %v1889_v8 = vadd.f32 %v1868_v55, %v3995_v53  ;;  %v2807_v33 = vpop.f32.mrb[179].mxu0  ;;  %2853 = vmatmul.mubr.bf16.gmra.mrb[172].mxu1 %v1940_v34 }
 0x25f   : > { %2856 = vmatprep.mubr.msk.bf16.mxu1 %vm3058_vm1, %v3057_v2 }
 0x260   : > { %v1914_v17 = vadd.f32 %v4000_v39, %v1889_v8  ;;  %v1931_v31 = vmax.f32 %v1913_v45, 0.0 }
 0x262   : > { %v1932_v7 = vmax.f32 %v1914_v17, 0.0 }
 0x264   : > { %v1941_v12 = vpack.c.bf16 %v1932_v7, %v1931_v31 }
 0x266   : > { %2857 = vmatmul.mubr.bf16.gmra.mrb[176].mxu1 %v1941_v12 }
 0x2f9   : > { %v2047_v53 = vpop.f32.mrb[144].mxu1 }
 0x2fa   : > { %v2048_v6 = vadd.f32 %v4060_v36, %v2047_v53  ;;  %v2826_v52 = vpop.f32.mrb[145].mxu1 }
 0x2fb   : > { %v2050_v41 = vpop.f32.mrb[146].mxu1 }
 0x2fc   : > { %2118 = vst [vmem:[%s4063_s13] sm:$0xff] %v2048_v6  ;;  %v2051_v2 = vadd.f32 %v4060_v36, %v2050_v41  ;;  %v2827_v39 = vpop.f32.mrb[147].mxu1 }
 0x2fe   : > { %2119 = vst [vmem:[%s4063_s13 + $0x8] sm:$0xff] %v2051_v2 }
 0x301   : > { %v2055_v40 = vpop.f32.mrb[148].mxu1 }
 0x302   : > { %v2056_v27 = vadd.f32 %v4060_v36, %v2055_v40  ;;  %v2830_v15 = vpop.f32.mrb[149].mxu1 }
 0x303   : > { %v2058_v57 = vpop.f32.mrb[150].mxu1 }
 0x304   : > { %2120 = vst [vmem:[%s4063_s13 + $0x10] sm:$0xff] %v2056_v27  ;;  %v2059_v10 = vadd.f32 %v4060_v36, %v2058_v57  ;;  %v2831_v51 = vpop.f32.mrb[151].mxu1 }
 0x306   : > { %2121 = vst [vmem:[%s4063_s13 + $0x18] sm:$0xff] %v2059_v10 }
 0x309   : > { %v2063_v25 = vpop.f32.mrb[152].mxu1 }
 0x30a   : > { %v2064_v59 = vadd.f32 %v4060_v36, %v2063_v25  ;;  %v2834_v60 = vpop.f32.mrb[153].mxu1 }
 0x30b   : > { %v2066_v26 = vpop.f32.mrb[154].mxu1 }
 0x30c   : > { %2122 = vst [vmem:[%s4063_s13 + $0x20] sm:$0xff] %v2064_v59  ;;  %v2067_v49 = vadd.f32 %v4060_v36, %v2066_v26  ;;  %v2835_v50 = vpop.f32.mrb[155].mxu1 }
 0x30e   : > { %2123 = vst [vmem:[%s4063_s13 + $0x28] sm:$0xff] %v2067_v49 }
 0x311   : > { %v2071_v32 = vpop.f32.mrb[156].mxu1 }
 0x312   : > { %v2072_v58 = vadd.f32 %v4060_v36, %v2071_v32  ;;  %v2838_v18 = vpop.f32.mrb[157].mxu1 }
 0x313   : > { %v2074_v19 = vpop.f32.mrb[158].mxu1 }
 0x314   : > { %2124 = vst [vmem:[%s4063_s13 + $0x30] sm:$0xff] %v2072_v58  ;;  %v2075_v3 = vadd.f32 %v4060_v36, %v2074_v19  ;;  %v2839_v13 = vpop.f32.mrb[159].mxu1 }
 0x316   : > { %2125 = vst [vmem:[%s4063_s13 + $0x38] sm:$0xff] %v2075_v3 }
 0x319   : > { %v2079_v56 = vpop.f32.mrb[160].mxu1 }
 0x31a   : > { %v2080_v20 = vadd.f32 %v4060_v36, %v2079_v56  ;;  %v2842_v22 = vpop.f32.mrb[161].mxu1 }
 0x31b   : > { %v2082_v43 = vpop.f32.mrb[162].mxu1 }
 0x31c   : > { %2126 = vst [vmem:[%s4063_s13 + $0x40] sm:$0xff] %v2080_v20  ;;  %v2083_v5 = vadd.f32 %v4060_v36, %v2082_v43  ;;  %v2843_v37 = vpop.f32.mrb[163].mxu1 }
 0x31e   : > { %2127 = vst [vmem:[%s4063_s13 + $0x48] sm:$0xff] %v2083_v5 }
 0x321   : > { %v2087_v16 = vpop.f32.mrb[164].mxu1 }
 0x322   : > { %v2088_v44 = vadd.f32 %v4060_v36, %v2087_v16  ;;  %v2846_v48 = vpop.f32.mrb[165].mxu1 }
 0x323   : > { %v2090_v11 = vpop.f32.mrb[166].mxu1 }
 0x324   : > { %2128 = vst [vmem:[%s4063_s13 + $0x50] sm:$0xff] %v2088_v44  ;;  %v2091_v47 = vadd.f32 %v4060_v36, %v2090_v11  ;;  %v2847_v1 = vpop.f32.mrb[167].mxu1 }
 0x326   : > { %2129 = vst [vmem:[%s4063_s13 + $0x58] sm:$0xff] %v2091_v47 }
 0x329   : > { %v2095_v38 = vpop.f32.mrb[168].mxu1 }
 0x32a   : > { %v2096_v30 = vadd.f32 %v4060_v36, %v2095_v38  ;;  %v2850_v24 = vpop.f32.mrb[169].mxu1 }
 0x32b   : > { %v2098_v62 = vpop.f32.mrb[170].mxu1 }
 0x32c   : > { %2130 = vst [vmem:[%s4063_s13 + $0x60] sm:$0xff] %v2096_v30  ;;  %v2099_v63 = vadd.f32 %v4060_v36, %v2098_v62  ;;  %v2851_v9 = vpop.f32.mrb[171].mxu1 }
 0x32e   : > { %2131 = vst [vmem:[%s4063_s13 + $0x68] sm:$0xff] %v2099_v63 }
 0x331   : > { %v2103_v0 = vpop.f32.mrb[172].mxu1 }
 0x332   : > { %v2104_v23 = vadd.f32 %v4060_v36, %v2103_v0  ;;  %v2854_v29 = vpop.f32.mrb[173].mxu1 }
 0x333   : > { %v2106_v42 = vpop.f32.mrb[174].mxu1 }
 0x334   : > { %2132 = vst [vmem:[%s4063_s13 + $0x70] sm:$0xff] %v2104_v23  ;;  %v2107_v4 = vadd.f32 %v4060_v36, %v2106_v42  ;;  %v2855_v46 = vpop.f32.mrb[175].mxu1 }
 0x336   : > { %2133 = vst [vmem:[%s4063_s13 + $0x78] sm:$0xff] %v2107_v4 }
 0x339   : > { %v2111_v21 = vpop.f32.mrb[176].mxu1 }
 0x33a   : > { %v2112_v54 = vadd.f32 %v4060_v36, %v2111_v21  ;;  %v2858_v61 = vpop.f32.mrb[177].mxu1 }
 0x33b   : > { %v2114_v28 = vpop.f32.mrb[178].mxu1 }
 0x33c   : > { %2134 = vst [vmem:[%s4063_s13 + $0x80] sm:$0xff] %v2112_v54  ;;  %v2115_v35 = vadd.f32 %v4060_v36, %v2114_v28  ;;  %v2859_v14 = vpop.f32.mrb[179].mxu1 }
 0x33e   : > { %2135 = vst [vmem:[%s4063_s13 + $0x88] sm:$0xff] %v2115_v35 }
 0x33f   : > { %2974 = shalt.err (!%p2971_p7)
}
 0x340   : > { %s2975_s8 = scalar_lea.hbm %s4103_s27, 2304  ;;  %s2979_s16 = scalar_lea.hbm %s4169_s5, 9216 }
 0x341   : > { %p2976_p9 = scmp.ne.s32.totalorder %s4103_s27, %s2975_s8  ;;  %p2980_p12 = scmp.lt.u32.totalorder %s4103_s27, %s4169_s5 }
 0x342   : > { %p2981_p13 = scmp.lt.u32.totalorder %s2979_s16, %s2975_s8  ;;  %p2983_p1 = scmp.lt.u32.totalorder %s2975_s8, %s4103_s27 }
 0x343   : > { %p2977_p10 = pnand %p2976_p9, %p3143_p3 }
 0x344   : > { %p2982_p0 = por %p2981_p13, %p2980_p12 }
 0x345   : > { %p2978_p11 = pneg %p2977_p10 }
 0x346   : > { %p2984_p2 = por %p2983_p1, %p2982_p0 }
 0x348   : > { %p2985_p4 = pnand %p2984_p2, %p2978_p11 }
 0x34a   : > { %2988 = shalt.err (!%p2985_p4)
}
 0x34b   : > { %s3060_s22 = smov 128   ;;  %s3061_s9 = smov 8  }
 0x34c   : > { %2864 = dma.vmem_to_hbm [thread:$0]  (%p3143_p3), %s4105_s26, 2304, %s4103_s27, %s4112_s30, %s3060_s22, %s3060_s22, %s3061_s9  }
 0x34d PF: > { %p2870_p5 = scmp.ge.s32.totalorder %s3055_s25, 2  ;;  %s2167_s10 = sand.u32 1, %s3027_s18  }
 0x34e   : > { %s2168_s12 = scalar_lea.sflag [#allocation3], %s2167_s10 }
 0x34f   : > { %p2867_p6 = pnand %p2870_p5, %p3152_p8 }
 0x351   : > { %3022 = dma.done.wait (!%p2867_p6), %s2168_s12, 2304  }
 0x352   : > { %3024 = vsyncadd (!%p2867_p6), %s2168_s12, 4294964992  ;;  %s18_s25 = sadd.s32 1, %s3055_s25   ;;  %s4172_s18 = smov %s3031_s19 }
 0x353   : > { %p15_p7 = scmp.ge.s32.totalorder %s18_s25, 6   ;;  %s4173_s19 = smov %s3035_s20 }
 0x354   : > { %s4174_s20 = smov %s3161_s11  ;;  %s4175_s21 = smov %s3047_s23 }
 0x355   : > { %s4176_s22 = smov %s3051_s24  ;;  %s4177_s23 = smov %s4180_s28 }
 0x356   : > { %s4178_s24 = smov %s4184_s29  ;;  %17 = sbr.rel (!%p15_p7) target bundleno = 5 (0x5), region = 83 }
 0x35d   :  { %2173 = vsyncpa [#allocation3], 1 }
 0x35e   :  { %2175 = vsyncpa [#allocation3 + $0x1], 1 }

</bundles_post_ra>
